<compile_context>
chip_gen: v5e
topology: v5e:2x2
jax: 0.10.0
libtpu: 0.0.40
codegen_flags: <defaults>
</compile_context>

<pallas_src>
import functools
import math

import jax
import jax.numpy as jnp
from jax.experimental import pallas as pl
from jax.experimental.pallas import tpu as pltpu

EPS_LN = 1e-5
NEG_INF = -1e30
MASK_VAL = -10000.0


def _round_up(x, m):
    return (x + m - 1) // m * m


def _masked_layer_norm(x, gamma, beta, col_mask, n_real):
    """Two-pass LayerNorm over the last axis, restricted to the first `n_real`
    lanes.  Padded lanes of `x` are zero and padded gamma/beta are zero, so
    padded output lanes stay exactly 0."""
    inv_n = 1.0 / float(n_real)
    mu = jnp.sum(x, axis=-1, keepdims=True) * inv_n
    d = x - mu
    if col_mask is not None:
        d = d * col_mask
    var = jnp.sum(d * d, axis=-1, keepdims=True) * inv_n
    return d * jax.lax.rsqrt(var + EPS_LN) * gamma + beta


def _layer_norm(x, gamma, beta):
    mu = jnp.mean(x, axis=-1, keepdims=True)
    var = jnp.mean((x - mu) ** 2, axis=-1, keepdims=True)
    return (x - mu) / jnp.sqrt(var + EPS_LN) * gamma + beta


def _el_kernel(ctx_ref, spans_ref, cand_ids_ref, prior_ref, cand_ref,
               wproj_ref, bproj_ref, vatt_ref, batt_ref,
               kg_g_ref, kg_b_ref, sp_g_ref, sp_b_ref,
               w1s_ref, w1p_ref, b1_ref, w2_ref, b2_ref, null_ref,
               link_ref, wemb_ref, span_ref, pbert_ref,
               *, e_real, decode_threshold):
    Tt = ctx_ref.shape[0]                      # tokens per tile (bt * T)
    St, C = cand_ids_ref.shape                 # spans per tile (bt * S), candidates
    Ep = wproj_ref.shape[1]                    # padded entity dim (multiple of 128)

    if Ep == e_real:
        col_mask = None
    else:
        lane = jax.lax.broadcasted_iota(jnp.int32, (1, Ep), 1)
        col_mask = (lane < e_real).astype(jnp.float32)

    # ---- 1) bert_to_kg_projector (MXU, bf16 in / f32 acc) --------------------
    proj = jnp.dot(ctx_ref[...], wproj_ref[...],
                   preferred_element_type=jnp.float32) + bproj_ref[...]   # (Tt, Ep)
    pbert_ref[...] = proj

    # ---- 2) span-attention logits, folded through the projector --------------
    # v_att = w_proj @ w_att was precomputed in the wrapper, so this tiny dot
    # depends only on ctx (no serial dependency on `proj`).
    att_row = jax.lax.dot_general(
        vatt_ref[...], ctx_ref[...],
        dimension_numbers=(((1,), (1,)), ((), ())),
        preferred_element_type=jnp.float32) + batt_ref[...]               # (1, Tt)

    # ---- 3) self-attentive span extractor ------------------------------------
    spans = spans_ref[...]                                                # (St, 2)
    starts = spans[:, 0:1]
    ends = spans[:, 1:2]
    t_idx = jax.lax.broadcasted_iota(jnp.int32, (St, Tt), 1)
    span_valid = starts > -1                                              # (St, 1)
    in_span = (t_idx >= starts) & (t_idx <= ends) & span_valid            # (St, Tt)

    masked_logits = jnp.where(in_span, att_row, NEG_INF)
    m = jnp.max(masked_logits, axis=-1, keepdims=True)
    e = jnp.exp(masked_logits - m) * in_span.astype(jnp.float32)
    wts = e / (jnp.sum(e, axis=-1, keepdims=True) + 1e-30)                # (St, Tt)

    mm_dtype = ctx_ref.dtype
    span_reps = jnp.dot(wts.astype(mm_dtype), proj.astype(mm_dtype),
                        preferred_element_type=jnp.float32)               # (St, Ep)
    span_reps = span_reps * span_valid.astype(jnp.float32)
    span_ln = _masked_layer_norm(span_reps, sp_g_ref[...], sp_b_ref[...],
                                 col_mask, e_real)
    span_ref[...] = span_ln

    # ---- 4) kg layer norm on pre-gathered candidate embeddings ---------------
    cand_ln = _masked_layer_norm(cand_ref[...], kg_g_ref[...], kg_b_ref[...],
                                 col_mask, e_real)                        # (C, St, Ep)

    # ---- 5) DotAttentionWithPrior: per-candidate scores ----------------------
    # Loop over the (small, static) candidate axis: each step is a fused
    # (St, Ep) multiply + lane reduce -> no (St, C, Ep) broadcast temporaries.
    inv_sqrt_e = 1.0 / math.sqrt(e_real)
    score_cols = [jnp.sum(span_ln * cand_ln[c], axis=-1, keepdims=True)
                  for c in range(C)]                                      # C x (St, 1)
    scores = jnp.concatenate(score_cols, axis=-1) * inv_sqrt_e            # (St, C)

    prior = prior_ref[...]                                                # (St, C)
    h = jnp.maximum(scores[:, :, None] * w1s_ref[...]
                    + prior[:, :, None] * w1p_ref[...]
                    + b1_ref[...], 0.0)                                   # (St, C, H)
    link = jnp.sum(h * w2_ref[...], axis=-1) + b2_ref[...]                # (St, C)

    emask = cand_ids_ref[...] > 0
    linking_scores = jnp.where(emask, link, MASK_VAL)
    link_ref[...] = linking_scores

    # ---- 6) thresholded softmax + weighted entity embedding ------------------
    below = linking_scores < decode_threshold
    ls2 = jnp.where(below, MASK_VAL, linking_scores)
    mmax = jnp.max(ls2, axis=-1, keepdims=True)
    ee = jnp.exp(ls2 - mmax)
    p = ee * pl.reciprocal(jnp.sum(ee, axis=-1, keepdims=True), approx=True)
    wemb = p[:, 0:1] * cand_ln[0]
    for c in range(1, C):
        wemb = wemb + p[:, c:c + 1] * cand_ln[c]                          # (St, Ep)
    all_below = jnp.sum(below.astype(jnp.int32), axis=-1, keepdims=True) == C
    wemb_ref[...] = jnp.where(all_below, null_ref[...], wemb)


def entity_linking_forward(contextual_embeddings, tokens_mask, candidate_spans,
                           candidate_entity_ids, candidate_entity_priors, params,
                           decode_threshold=0.0, batch_tile=None,
                           matmul_dtype=jnp.bfloat16):
    del tokens_mask  # SelfAttentiveSpanExtractor does not use the sequence mask
    B, T, D = contextual_embeddings.shape
    _, S, C = candidate_entity_ids.shape
    V, E = params["entity_table"].shape
    H = params["b1"].shape[-1]
    Ep = _round_up(E, 128)

    # batch tile: cap bt (<=4, ~128 MXU rows) to contain the bt^2
    # span-extractor waste; keep G = B // bt >= 2 so the "parallel" grid axis
    # can shard across both TensorCores on v7x.
    if batch_tile is None:
        bt = min(B, 4, max(1, 128 // max(T, 1)))
        if B >= 2:
            bt = max(1, min(bt, B // 2))
    else:
        bt = max(1, min(batch_tile, B))
    while B % bt:
        bt -= 1
    G = B // bt
    Tt, St = bt * T, bt * S

    # bf16 tiles need a sublane multiple of 16 (or full-extent); otherwise fall
    # back to f32 matmul inputs.
    if matmul_dtype == jnp.bfloat16 and (Tt % 16 != 0 and Tt != B * T):
        matmul_dtype = jnp.float32

    def pad_e(x):
        if Ep == E:
            return x
        return jnp.pad(x, [(0, 0)] * (x.ndim - 1) + [(0, Ep - E)])

    etab_p = pad_e(params["entity_table"].astype(jnp.float32))            # (V, Ep)
    w_proj_p = pad_e(params["w_proj"].astype(jnp.float32)).astype(matmul_dtype)
    b_proj_p = pad_e(params["b_proj"].astype(jnp.float32))
    kg_g = pad_e(params["kg_gamma"].astype(jnp.float32))
    kg_b = pad_e(params["kg_beta"].astype(jnp.float32))
    sp_g = pad_e(params["sp_gamma"].astype(jnp.float32))
    sp_b = pad_e(params["sp_beta"].astype(jnp.float32))
    null_p = pad_e(params["null_embedding"].astype(jnp.float32))

    # fold the span-attention vector through the projector (exact identity):
    # att = proj @ w_att + b_att = ctx @ (w_proj @ w_att) + (b_proj @ w_att + b_att)
    w_att = params["w_att"].astype(jnp.float32)                           # (1, E)
    v_att = (params["w_proj"].astype(jnp.float32) @ w_att[0])[None, :].astype(matmul_dtype)
    b_att_fold = (jnp.sum(params["b_proj"].astype(jnp.float32)[0] * w_att[0])
                  + params["b_att"].astype(jnp.float32)[0, 0]).reshape(1, 1).astype(jnp.float32)

    # flatten batch into row tiles; offset spans into tile-local token indices
    ctx_flat = contextual_embeddings.reshape(B * T, D).astype(matmul_dtype)
    offs = ((jnp.arange(B, dtype=jnp.int32) % bt) * T)[:, None, None]
    spans_off = jnp.where(candidate_spans >= 0,
                          candidate_spans.astype(jnp.int32) + offs, -1)
    spans_flat = spans_off.reshape(B * S, 2).astype(jnp.int32)
    cand_ids_flat = candidate_entity_ids.reshape(B * S, C).astype(jnp.int32)
    priors_flat = candidate_entity_priors.reshape(B * S, C).astype(jnp.float32)

    # pre-gather candidate entity rows in (C, B*S, Ep) layout so the kernel
    # receives them as one contiguous, auto double-buffered block per step.
    ids_t = jnp.clip(cand_ids_flat, 0, V - 1).T                           # (C, B*S)
    cand_emb_t = jnp.take(etab_p, ids_t, axis=0)                          # (C, B*S, Ep)

    def tiled(block):
        return pl.BlockSpec(block, lambda g: (g, 0))

    def const2(shape):
        return pl.BlockSpec(shape, lambda g: (0, 0))

    in_specs = [
        tiled((Tt, D)),                          # contextual embeddings (flat rows)
        tiled((St, 2)),                          # spans (tile-local token offsets)
        tiled((St, C)),                          # candidate ids (for the mask)
        tiled((St, C)),                          # candidate priors
        pl.BlockSpec((C, St, Ep), lambda g: (0, g, 0)),   # gathered cand embeddings
        const2((D, Ep)), const2((1, Ep)),        # projector W, b (E-padded)
        const2((1, D)), const2((1, 1)),          # folded attention vector / bias
        const2((1, Ep)), const2((1, Ep)),        # kg layernorm gamma, beta
        const2((1, Ep)), const2((1, Ep)),        # span layernorm gamma, beta
        const2((1, H)), const2((1, H)), const2((1, H)),   # MLP layer-1 (score, prior, b)
        const2((1, H)), const2((1, 1)),          # MLP layer-2 w, b
        const2((1, Ep)),                         # null embedding
    ]
    out_specs = [tiled((St, C)), tiled((St, Ep)), tiled((St, Ep)), tiled((Tt, Ep))]
    out_shape = (
        jax.ShapeDtypeStruct((B * S, C), jnp.float32),
        jax.ShapeDtypeStruct((B * S, Ep), jnp.float32),
        jax.ShapeDtypeStruct((B * S, Ep), jnp.float32),
        jax.ShapeDtypeStruct((B * T, Ep), jnp.float32),
    )

    # VMEM budget: half the physical capacity, capped at 48 MiB (=> ~32 MiB on
    # 64 MiB v7x, 48 MiB on v5e/v6e).
    try:
        info = pltpu.get_tpu_info()
        vmem_cap = int(getattr(info, "vmem_capacity_bytes", 64 * 1024 * 1024))
    except Exception:  # pragma: no cover - conservative fallback
        vmem_cap = 64 * 1024 * 1024
    vmem_limit = min(48 * 1024 * 1024, max(vmem_cap // 2, 16 * 1024 * 1024))

    kernel = functools.partial(_el_kernel, e_real=E,
                               decode_threshold=float(decode_threshold))
    outs = pl.pallas_call(
        kernel,
        out_shape=out_shape,
        grid_spec=pltpu.PrefetchScalarGridSpec(
            num_scalar_prefetch=0, grid=(G,),
            in_specs=in_specs, out_specs=out_specs),
        compiler_params=pltpu.CompilerParams(
            dimension_semantics=("parallel",),
            vmem_limit_bytes=vmem_limit),
    )(ctx_flat, spans_flat, cand_ids_flat, priors_flat, cand_emb_t,
      w_proj_p, b_proj_p, v_att, b_att_fold,
      kg_g, kg_b, sp_g, sp_b,
      params["w1_score"].astype(jnp.float32), params["w1_prior"].astype(jnp.float32),
      params["b1"].astype(jnp.float32), params["w2"].astype(jnp.float32),
      params["b2"].astype(jnp.float32), null_p)

    linking, wemb, span_ln, pbert = outs
    return {
        "linking_scores": linking.reshape(B, S, C),
        "weighted_entity_embeddings": wemb[:, :E].reshape(B, S, E),
        "projected_span_representations": span_ln[:, :E].reshape(B, S, E),
        "projected_bert_representations": pbert[:, :E].reshape(B, T, E),
    }


def reference_forward(ctx, spans, cand_ids, priors, params, decode_threshold=0.0,
                      matmul_dtype=jnp.bfloat16):
    """Pure-JAX mirror of the forward (same bf16 matmul casts as the kernel)."""
    w = params
    B, T, D = ctx.shape
    E = w["entity_table"].shape[1]
    cand_emb = w["entity_table"][cand_ids]
    cand_ln = _layer_norm(cand_emb, w["kg_gamma"], w["kg_beta"])
    proj = jnp.einsum("btd,de->bte", ctx.astype(matmul_dtype),
                      w["w_proj"].astype(matmul_dtype),
                      preferred_element_type=jnp.float32) + w["b_proj"]
    att = jnp.einsum("bte,e->bt", proj, w["w_att"][0]) + w["b_att"][0, 0]
    starts, ends = spans[..., 0], spans[..., 1]
    t = jnp.arange(T)
    valid = starts > -1
    in_span = ((t[None, None, :] >= starts[..., None])
               & (t[None, None, :] <= ends[..., None]) & valid[..., None])
    ml = jnp.where(in_span, att[:, None, :], NEG_INF)
    m = ml.max(-1, keepdims=True)
    e = jnp.exp(ml - m) * in_span
    wts = e / (e.sum(-1, keepdims=True) + 1e-30)
    span_reps = jnp.einsum("bst,bte->bse", wts.astype(matmul_dtype),
                           proj.astype(matmul_dtype),
                           preferred_element_type=jnp.float32) * valid[..., None]
    span_ln = _layer_norm(span_reps, w["sp_gamma"], w["sp_beta"])
    scores = jnp.sum(span_ln[:, :, None, :] * cand_ln, -1) / math.sqrt(E)
    h = jax.nn.relu(scores[..., None] * w["w1_score"][0]
                    + priors[..., None] * w["w1_prior"][0] + w["b1"][0])
    link = jnp.sum(h * w["w2"][0], -1) + w["b2"][0, 0]
    emask = cand_ids > 0
    linking = jnp.where(emask, link, MASK_VAL)
    below = linking < decode_threshold
    ls2 = jnp.where(below, MASK_VAL, linking)
    p = jax.nn.softmax(ls2, -1)
    wemb = jnp.sum(p[..., None] * cand_ln, axis=2)
    all_below = jnp.all(below, -1)
    wemb = jnp.where(all_below[..., None], w["null_embedding"], wemb)
    return linking, wemb, span_ln, proj


if __name__ == "__main__":
    # small shapes consistent with the module
    B, T, D, E, S, C, H, V = 2, 16, 32, 32, 8, 4, 16, 20
    null_entity_id = V - 1
    decode_threshold = 0.0  # margin loss default -> weighted_entity_threshold = 0.0

    key = jax.random.PRNGKey(0)
    ks = jax.random.split(key, 20)

    entity_table = jax.random.normal(ks[0], (V, E), jnp.float32)
    params = dict(
        entity_table=entity_table,
        w_proj=jax.random.normal(ks[1], (D, E), jnp.float32) * 0.1,
        b_proj=jax.random.normal(ks[2], (1, E), jnp.float32) * 0.02,
        w_att=jax.random.normal(ks[3], (1, E), jnp.float32) * 0.1,
        b_att=jnp.zeros((1, 1), jnp.float32),
        kg_gamma=jnp.ones((1, E), jnp.float32),
        kg_beta=jnp.zeros((1, E), jnp.float32),
        sp_gamma=jnp.ones((1, E), jnp.float32),
        sp_beta=jnp.zeros((1, E), jnp.float32),
        w1_score=jax.random.normal(ks[4], (1, H), jnp.float32) * 0.5,
        w1_prior=jax.random.normal(ks[5], (1, H), jnp.float32) * 0.5,
        b1=jax.random.normal(ks[6], (1, H), jnp.float32) * 0.05,
        w2=jax.random.normal(ks[7], (1, H), jnp.float32) * 0.5,
        b2=jax.random.normal(ks[8], (1, 1), jnp.float32) * 0.05,
        null_embedding=entity_table[null_entity_id][None, :],
    )

    contextual_embeddings = jax.random.normal(ks[10], (B, T, D), jnp.float32)
    tokens_mask = jnp.ones((B, T), jnp.int32)

    starts = jax.random.randint(ks[11], (B, S), 0, T - 3)
    widths = jax.random.randint(ks[12], (B, S), 1, 4)
    ends = jnp.minimum(starts + widths - 1, T - 1)
    spans = jnp.stack([starts, ends], axis=-1).astype(jnp.int32)
    pad = jnp.arange(S) >= S - 2                     # last 2 spans are padding
    spans = jnp.where(pad[None, :, None], -1, spans)

    cand_ids = jax.random.randint(ks[13], (B, S, C), 1, V).astype(jnp.int32)
    drop = jax.random.bernoulli(ks[14], 0.3, (B, S, C))
    cand_ids = jnp.where(drop, 0, cand_ids)
    cand_ids = jnp.where(pad[None, :, None], 0, cand_ids)
    priors = jax.nn.softmax(jax.random.normal(ks[15], (B, S, C), jnp.float32), -1)

    out = entity_linking_forward(contextual_embeddings, tokens_mask, spans,
                                 cand_ids, priors, params,
                                 decode_threshold=decode_threshold)
    out = jax.block_until_ready(out)

    ref = reference_forward(contextual_embeddings, spans, cand_ids, priors, params,
                            decode_threshold=decode_threshold)
    names = ["linking_scores", "weighted_entity_embeddings",
             "projected_span_representations", "projected_bert_representations"]
    for name, r in zip(names, ref):
        k = out[name]
        assert k.shape == r.shape and k.dtype == r.dtype, (name, k.shape, r.shape)
        err = float(jnp.max(jnp.abs(k - r)))
        assert jnp.allclose(k, r, rtol=1e-2, atol=1e-2), f"{name} mismatch, max err {err}"

    print("KERNEL_OK")
</pallas_src>

<mosaic_0001>
module attributes {stable_mosaic.version = 11 : i64} {
  func.func @_el_kernel(%arg0: i32, %arg1: memref<16x32xbf16, #tpu.memory_space<vmem>>, %arg2: memref<8x2xi32, #tpu.memory_space<vmem>>, %arg3: memref<8x4xi32, #tpu.memory_space<vmem>>, %arg4: memref<8x4xf32, #tpu.memory_space<vmem>>, %arg5: memref<4x8x128xf32, #tpu.memory_space<vmem>>, %arg6: memref<32x128xbf16, #tpu.memory_space<vmem>>, %arg7: memref<1x128xf32, #tpu.memory_space<vmem>>, %arg8: memref<1x32xbf16, #tpu.memory_space<vmem>>, %arg9: memref<1x1xf32, #tpu.memory_space<vmem>>, %arg10: memref<1x128xf32, #tpu.memory_space<vmem>>, %arg11: memref<1x128xf32, #tpu.memory_space<vmem>>, %arg12: memref<1x128xf32, #tpu.memory_space<vmem>>, %arg13: memref<1x128xf32, #tpu.memory_space<vmem>>, %arg14: memref<1x16xf32, #tpu.memory_space<vmem>>, %arg15: memref<1x16xf32, #tpu.memory_space<vmem>>, %arg16: memref<1x16xf32, #tpu.memory_space<vmem>>, %arg17: memref<1x16xf32, #tpu.memory_space<vmem>>, %arg18: memref<1x1xf32, #tpu.memory_space<vmem>>, %arg19: memref<1x128xf32, #tpu.memory_space<vmem>>, %arg20: memref<8x4xf32, #tpu.memory_space<vmem>>, %arg21: memref<8x128xf32, #tpu.memory_space<vmem>>, %arg22: memref<8x128xf32, #tpu.memory_space<vmem>>, %arg23: memref<16x128xf32, #tpu.memory_space<vmem>>) attributes {dimension_semantics = [#tpu.dimension_semantics<parallel>], iteration_bounds = array<i64: 2>, scalar_prefetch = 0 : i64, scratch_operands = 0 : i64, tpu.core_type = #tpu.core_type<tc>, window_params = [{transform_indices = @transform_0, window_bounds = array<i64: 16, 32>}, {transform_indices = @transform_1, window_bounds = array<i64: 8, 2>}, {transform_indices = @transform_2, window_bounds = array<i64: 8, 4>}, {transform_indices = @transform_3, window_bounds = array<i64: 8, 4>}, {transform_indices = @transform_4, window_bounds = array<i64: 4, 8, 128>}, {pipeline_mode = #tpu.pipeline_mode<synchronous>, transform_indices = @transform_5, window_bounds = array<i64: 32, 128>}, {pipeline_mode = #tpu.pipeline_mode<synchronous>, transform_indices = @transform_6, window_bounds = array<i64: 1, 128>}, {pipeline_mode = #tpu.pipeline_mode<synchronous>, transform_indices = @transform_7, window_bounds = array<i64: 1, 32>}, {pipeline_mode = #tpu.pipeline_mode<synchronous>, transform_indices = @transform_8, window_bounds = array<i64: 1, 1>}, {pipeline_mode = #tpu.pipeline_mode<synchronous>, transform_indices = @transform_9, window_bounds = array<i64: 1, 128>}, {pipeline_mode = #tpu.pipeline_mode<synchronous>, transform_indices = @transform_10, window_bounds = array<i64: 1, 128>}, {pipeline_mode = #tpu.pipeline_mode<synchronous>, transform_indices = @transform_11, window_bounds = array<i64: 1, 128>}, {pipeline_mode = #tpu.pipeline_mode<synchronous>, transform_indices = @transform_12, window_bounds = array<i64: 1, 128>}, {pipeline_mode = #tpu.pipeline_mode<synchronous>, transform_indices = @transform_13, window_bounds = array<i64: 1, 16>}, {pipeline_mode = #tpu.pipeline_mode<synchronous>, transform_indices = @transform_14, window_bounds = array<i64: 1, 16>}, {pipeline_mode = #tpu.pipeline_mode<synchronous>, transform_indices = @transform_15, window_bounds = array<i64: 1, 16>}, {pipeline_mode = #tpu.pipeline_mode<synchronous>, transform_indices = @transform_16, window_bounds = array<i64: 1, 16>}, {pipeline_mode = #tpu.pipeline_mode<synchronous>, transform_indices = @transform_17, window_bounds = array<i64: 1, 1>}, {pipeline_mode = #tpu.pipeline_mode<synchronous>, transform_indices = @transform_18, window_bounds = array<i64: 1, 128>}, {transform_indices = @transform_19, window_bounds = array<i64: 8, 4>}, {transform_indices = @transform_20, window_bounds = array<i64: 8, 128>}, {transform_indices = @transform_21, window_bounds = array<i64: 8, 128>}, {transform_indices = @transform_22, window_bounds = array<i64: 16, 128>}]} {
    %0 = tpu.iota {dimensions = array<i32: 1>} : vector<1x128xi32>
    %c32_i32 = arith.constant 32 : i32
    %1 = vector.broadcast %c32_i32 : i32 to vector<1x128xi32>
    %2 = arith.cmpi slt, %0, %1 : vector<1x128xi32>
    %3 = arith.extui %2 : vector<1x128xi1> to vector<1x128xi32>
    %4 = arith.sitofp %3 : vector<1x128xi32> to vector<1x128xf32>
    %c0 = arith.constant 0 : index
    %c0_0 = arith.constant 0 : index
    %5 = vector.load %arg1[%c0, %c0_0] : memref<16x32xbf16, #tpu.memory_space<vmem>>, vector<16x32xbf16>
    %c0_1 = arith.constant 0 : index
    %c0_2 = arith.constant 0 : index
    %6 = vector.load %arg6[%c0_1, %c0_2] : memref<32x128xbf16, #tpu.memory_space<vmem>>, vector<32x128xbf16>
    %cst = arith.constant dense<0.000000e+00> : vector<16x128xf32>
    %7 = tpu.matmul %5, %6, %cst {dimension_numbers = #tpu.dot_dimension_numbers<[1], [0], [0], [1], [0, 0, 1, 1], [], []>} : vector<16x32xbf16>, vector<32x128xbf16>, vector<16x128xf32> -> vector<16x128xf32>
    %c0_3 = arith.constant 0 : index
    %c0_4 = arith.constant 0 : index
    %8 = vector.load %arg7[%c0_3, %c0_4] : memref<1x128xf32, #tpu.memory_space<vmem>>, vector<1x128xf32>
    %9 = vector.broadcast %8 : vector<1x128xf32> to vector<16x128xf32>
    %10 = arith.addf %7, %9 : vector<16x128xf32>
    %c0_5 = arith.constant 0 : index
    %c0_6 = arith.constant 0 : index
    %11 = vector.load %arg23[%c0_5, %c0_6] : memref<16x128xf32, #tpu.memory_space<vmem>>, vector<16x128xf32>
    tpu.vector_store %arg23[%c0_5, %c0_6], %10 {strides = array<i32>} : memref<16x128xf32, #tpu.memory_space<vmem>>, vector<16x128xf32>,
    %c0_7 = arith.constant 0 : index
    %c0_8 = arith.constant 0 : index
    %12 = vector.load %arg8[%c0_7, %c0_8] : memref<1x32xbf16, #tpu.memory_space<vmem>>, vector<1x32xbf16>
    %c0_9 = arith.constant 0 : index
    %c0_10 = arith.constant 0 : index
    %13 = vector.load %arg1[%c0_9, %c0_10] : memref<16x32xbf16, #tpu.memory_space<vmem>>, vector<16x32xbf16>
    %cst_11 = arith.constant dense<0.000000e+00> : vector<1x16xf32>
    %14 = tpu.matmul %12, %13, %cst_11 {dimension_numbers = #tpu.dot_dimension_numbers<[1], [1], [0], [0], [0, 0, 1, 0], [], []>} : vector<1x32xbf16>, vector<16x32xbf16>, vector<1x16xf32> -> vector<1x16xf32>
    %c0_12 = arith.constant 0 : index
    %c0_13 = arith.constant 0 : index
    %15 = vector.load %arg9[%c0_12, %c0_13] : memref<1x1xf32, #tpu.memory_space<vmem>>, vector<1x1xf32>
    %16 = vector.broadcast %15 : vector<1x1xf32> to vector<1x16xf32>
    %17 = arith.addf %14, %16 : vector<1x16xf32>
    %c0_14 = arith.constant 0 : index
    %c0_15 = arith.constant 0 : index
    %18 = vector.load %arg2[%c0_14, %c0_15] : memref<8x2xi32, #tpu.memory_space<vmem>>, vector<8x2xi32>
    %19 = vector.extract_strided_slice %18 {offsets = [0, 0], sizes = [8, 1], strides = [1, 1]} : vector<8x2xi32> to vector<8x1xi32>
    %20 = vector.extract_strided_slice %18 {offsets = [0, 1], sizes = [8, 1], strides = [1, 1]} : vector<8x2xi32> to vector<8x1xi32>
    %21 = tpu.iota {dimensions = array<i32: 1>} : vector<8x16xi32>
    %c-1_i32 = arith.constant -1 : i32
    %22 = vector.broadcast %c-1_i32 : i32 to vector<8x1xi32>
    %23 = arith.cmpi sgt, %19, %22 : vector<8x1xi32>
    %24 = vector.broadcast %19 : vector<8x1xi32> to vector<8x16xi32>
    %25 = arith.cmpi sge, %21, %24 : vector<8x16xi32>
    %26 = vector.broadcast %20 : vector<8x1xi32> to vector<8x16xi32>
    %27 = arith.cmpi sle, %21, %26 : vector<8x16xi32>
    %28 = arith.andi %25, %27 : vector<8x16xi1>
    %29 = vector.broadcast %23 : vector<8x1xi1> to vector<8x16xi1>
    %30 = arith.andi %28, %29 : vector<8x16xi1>
    %cst_16 = arith.constant -1.000000e+30 : f32
    %31 = vector.shape_cast %17 : vector<1x16xf32> to vector<1x16xf32>
    %32 = vector.broadcast %31 : vector<1x16xf32> to vector<8x16xf32>
    %33 = vector.broadcast %cst_16 : f32 to vector<8x16xf32>
    %34 = arith.select %30, %32, %33 : vector<8x16xi1>, vector<8x16xf32>
    %cst_17 = arith.constant dense<0xFF800000> : vector<8xf32>
    %35 = vector.multi_reduction <maximumf>, %34, %cst_17 [1] : vector<8x16xf32> to vector<8xf32>
    %36 = vector.shape_cast %35 : vector<8xf32> to vector<8x1xf32>
    %37 = vector.broadcast %36 : vector<8x1xf32> to vector<8x16xf32>
    %38 = arith.subf %34, %37 : vector<8x16xf32>
    %39 = math.exp %38 : vector<8x16xf32>
    %40 = arith.extui %30 : vector<8x16xi1> to vector<8x16xi32>
    %41 = arith.sitofp %40 : vector<8x16xi32> to vector<8x16xf32>
    %42 = arith.mulf %39, %41 : vector<8x16xf32>
    %cst_18 = arith.constant dense<0.000000e+00> : vector<8xf32>
    %43 = vector.multi_reduction <add>, %42, %cst_18 [1] : vector<8x16xf32> to vector<8xf32>
    %44 = vector.shape_cast %43 : vector<8xf32> to vector<8x1xf32>
    %cst_19 = arith.constant 1.000000e-30 : f32
    %45 = vector.broadcast %cst_19 : f32 to vector<8x1xf32>
    %46 = arith.addf %44, %45 : vector<8x1xf32>
    %47 = vector.broadcast %46 : vector<8x1xf32> to vector<8x16xf32>
    %48 = arith.divf %42, %47 : vector<8x16xf32>
    %49 = arith.truncf %48 : vector<8x16xf32> to vector<8x16xbf16>
    %50 = arith.truncf %10 : vector<16x128xf32> to vector<16x128xbf16>
    %cst_20 = arith.constant dense<0.000000e+00> : vector<8x128xf32>
    %51 = tpu.matmul %49, %50, %cst_20 {dimension_numbers = #tpu.dot_dimension_numbers<[1], [0], [0], [1], [0, 0, 1, 1], [], []>} : vector<8x16xbf16>, vector<16x128xbf16>, vector<8x128xf32> -> vector<8x128xf32>
    %52 = arith.extui %23 : vector<8x1xi1> to vector<8x1xi32>
    %53 = arith.sitofp %52 : vector<8x1xi32> to vector<8x1xf32>
    %54 = vector.broadcast %53 : vector<8x1xf32> to vector<8x128xf32>
    %55 = arith.mulf %51, %54 : vector<8x128xf32>
    %c0_21 = arith.constant 0 : index
    %c0_22 = arith.constant 0 : index
    %56 = vector.load %arg12[%c0_21, %c0_22] : memref<1x128xf32, #tpu.memory_space<vmem>>, vector<1x128xf32>
    %c0_23 = arith.constant 0 : index
    %c0_24 = arith.constant 0 : index
    %57 = vector.load %arg13[%c0_23, %c0_24] : memref<1x128xf32, #tpu.memory_space<vmem>>, vector<1x128xf32>
    %cst_25 = arith.constant dense<0.000000e+00> : vector<8xf32>
    %58 = vector.multi_reduction <add>, %55, %cst_25 [1] : vector<8x128xf32> to vector<8xf32>
    %59 = vector.shape_cast %58 : vector<8xf32> to vector<8x1xf32>
    %cst_26 = arith.constant 3.125000e-02 : f32
    %60 = vector.broadcast %cst_26 : f32 to vector<8x1xf32>
    %61 = arith.mulf %59, %60 : vector<8x1xf32>
    %62 = vector.broadcast %61 : vector<8x1xf32> to vector<8x128xf32>
    %63 = arith.subf %55, %62 : vector<8x128xf32>
    %64 = vector.broadcast %4 : vector<1x128xf32> to vector<8x128xf32>
    %65 = arith.mulf %63, %64 : vector<8x128xf32>
    %66 = arith.mulf %65, %65 : vector<8x128xf32>
    %cst_27 = arith.constant dense<0.000000e+00> : vector<8xf32>
    %67 = vector.multi_reduction <add>, %66, %cst_27 [1] : vector<8x128xf32> to vector<8xf32>
    %68 = vector.shape_cast %67 : vector<8xf32> to vector<8x1xf32>
    %cst_28 = arith.constant 3.125000e-02 : f32
    %69 = vector.broadcast %cst_28 : f32 to vector<8x1xf32>
    %70 = arith.mulf %68, %69 : vector<8x1xf32>
    %cst_29 = arith.constant 9.99999974E-6 : f32
    %71 = vector.broadcast %cst_29 : f32 to vector<8x1xf32>
    %72 = arith.addf %70, %71 : vector<8x1xf32>
    %73 = math.rsqrt %72 : vector<8x1xf32>
    %74 = vector.broadcast %73 : vector<8x1xf32> to vector<8x128xf32>
    %75 = arith.mulf %65, %74 : vector<8x128xf32>
    %76 = vector.broadcast %56 : vector<1x128xf32> to vector<8x128xf32>
    %77 = arith.mulf %75, %76 : vector<8x128xf32>
    %78 = vector.broadcast %57 : vector<1x128xf32> to vector<8x128xf32>
    %79 = arith.addf %77, %78 : vector<8x128xf32>
    %c0_30 = arith.constant 0 : index
    %c0_31 = arith.constant 0 : index
    %80 = vector.load %arg22[%c0_30, %c0_31] : memref<8x128xf32, #tpu.memory_space<vmem>>, vector<8x128xf32>
    tpu.vector_store %arg22[%c0_30, %c0_31], %79 {strides = array<i32>} : memref<8x128xf32, #tpu.memory_space<vmem>>, vector<8x128xf32>,
    %c0_32 = arith.constant 0 : index
    %c0_33 = arith.constant 0 : index
    %c0_34 = arith.constant 0 : index
    %81 = vector.load %arg5[%c0_32, %c0_33, %c0_34] : memref<4x8x128xf32, #tpu.memory_space<vmem>>, vector<4x8x128xf32>
    %c0_35 = arith.constant 0 : index
    %c0_36 = arith.constant 0 : index
    %82 = vector.load %arg10[%c0_35, %c0_36] : memref<1x128xf32, #tpu.memory_space<vmem>>, vector<1x128xf32>
    %c0_37 = arith.constant 0 : index
    %c0_38 = arith.constant 0 : index
    %83 = vector.load %arg11[%c0_37, %c0_38] : memref<1x128xf32, #tpu.memory_space<vmem>>, vector<1x128xf32>
    %cst_39 = arith.constant dense<0.000000e+00> : vector<4x8xf32>
    %84 = vector.multi_reduction <add>, %81, %cst_39 [2] : vector<4x8x128xf32> to vector<4x8xf32>
    %85 = vector.shape_cast %84 : vector<4x8xf32> to vector<4x8x1xf32>
    %cst_40 = arith.constant 3.125000e-02 : f32
    %86 = vector.broadcast %cst_40 : f32 to vector<4x8x1xf32>
    %87 = arith.mulf %85, %86 : vector<4x8x1xf32>
    %88 = vector.broadcast %87 : vector<4x8x1xf32> to vector<4x8x128xf32>
    %89 = arith.subf %81, %88 : vector<4x8x128xf32>
    %90 = vector.shape_cast %4 : vector<1x128xf32> to vector<1x1x128xf32>
    %91 = vector.broadcast %90 : vector<1x1x128xf32> to vector<4x8x128xf32>
    %92 = arith.mulf %89, %91 : vector<4x8x128xf32>
    %93 = arith.mulf %92, %92 : vector<4x8x128xf32>
    %cst_41 = arith.constant dense<0.000000e+00> : vector<4x8xf32>
    %94 = vector.multi_reduction <add>, %93, %cst_41 [2] : vector<4x8x128xf32> to vector<4x8xf32>
    %95 = vector.shape_cast %94 : vector<4x8xf32> to vector<4x8x1xf32>
    %cst_42 = arith.constant 3.125000e-02 : f32
    %96 = vector.broadcast %cst_42 : f32 to vector<4x8x1xf32>
    %97 = arith.mulf %95, %96 : vector<4x8x1xf32>
    %cst_43 = arith.constant 9.99999974E-6 : f32
    %98 = vector.broadcast %cst_43 : f32 to vector<4x8x1xf32>
    %99 = arith.addf %97, %98 : vector<4x8x1xf32>
    %100 = math.rsqrt %99 : vector<4x8x1xf32>
    %101 = vector.broadcast %100 : vector<4x8x1xf32> to vector<4x8x128xf32>
    %102 = arith.mulf %92, %101 : vector<4x8x128xf32>
    %103 = vector.shape_cast %82 : vector<1x128xf32> to vector<1x1x128xf32>
    %104 = vector.broadcast %103 : vector<1x1x128xf32> to vector<4x8x128xf32>
    %105 = arith.mulf %102, %104 : vector<4x8x128xf32>
    %106 = vector.shape_cast %83 : vector<1x128xf32> to vector<1x1x128xf32>
    %107 = vector.broadcast %106 : vector<1x1x128xf32> to vector<4x8x128xf32>
    %108 = arith.addf %105, %107 : vector<4x8x128xf32>
    %109 = vector.extract_strided_slice %108 {offsets = [0, 0, 0], sizes = [1, 8, 128], strides = [1, 1, 1]} : vector<4x8x128xf32> to vector<1x8x128xf32>
    %110 = vector.shape_cast %109 : vector<1x8x128xf32> to vector<8x128xf32>
    %111 = arith.mulf %79, %110 : vector<8x128xf32>
    %cst_44 = arith.constant dense<0.000000e+00> : vector<8xf32>
    %112 = vector.multi_reduction <add>, %111, %cst_44 [1] : vector<8x128xf32> to vector<8xf32>
    %113 = vector.shape_cast %112 : vector<8xf32> to vector<8x1xf32>
    %114 = vector.extract_strided_slice %108 {offsets = [1, 0, 0], sizes = [1, 8, 128], strides = [1, 1, 1]} : vector<4x8x128xf32> to vector<1x8x128xf32>
    %115 = vector.shape_cast %114 : vector<1x8x128xf32> to vector<8x128xf32>
    %116 = arith.mulf %79, %115 : vector<8x128xf32>
    %cst_45 = arith.constant dense<0.000000e+00> : vector<8xf32>
    %117 = vector.multi_reduction <add>, %116, %cst_45 [1] : vector<8x128xf32> to vector<8xf32>
    %118 = vector.shape_cast %117 : vector<8xf32> to vector<8x1xf32>
    %119 = vector.extract_strided_slice %108 {offsets = [2, 0, 0], sizes = [1, 8, 128], strides = [1, 1, 1]} : vector<4x8x128xf32> to vector<1x8x128xf32>
    %120 = vector.shape_cast %119 : vector<1x8x128xf32> to vector<8x128xf32>
    %121 = arith.mulf %79, %120 : vector<8x128xf32>
    %cst_46 = arith.constant dense<0.000000e+00> : vector<8xf32>
    %122 = vector.multi_reduction <add>, %121, %cst_46 [1] : vector<8x128xf32> to vector<8xf32>
    %123 = vector.shape_cast %122 : vector<8xf32> to vector<8x1xf32>
    %124 = vector.extract_strided_slice %108 {offsets = [3, 0, 0], sizes = [1, 8, 128], strides = [1, 1, 1]} : vector<4x8x128xf32> to vector<1x8x128xf32>
    %125 = vector.shape_cast %124 : vector<1x8x128xf32> to vector<8x128xf32>
    %126 = arith.mulf %79, %125 : vector<8x128xf32>
    %cst_47 = arith.constant dense<0.000000e+00> : vector<8xf32>
    %127 = vector.multi_reduction <add>, %126, %cst_47 [1] : vector<8x128xf32> to vector<8xf32>
    %128 = vector.shape_cast %127 : vector<8xf32> to vector<8x1xf32>
    %129 = tpu.concatenate %113, %118, %123, %128 in 1 : vector<8x1xf32>, vector<8x1xf32>, vector<8x1xf32>, vector<8x1xf32> -> vector<8x4xf32>
    %cst_48 = arith.constant 0.176776692 : f32
    %130 = vector.broadcast %cst_48 : f32 to vector<8x4xf32>
    %131 = arith.mulf %129, %130 : vector<8x4xf32>
    %c0_49 = arith.constant 0 : index
    %c0_50 = arith.constant 0 : index
    %132 = vector.load %arg4[%c0_49, %c0_50] : memref<8x4xf32, #tpu.memory_space<vmem>>, vector<8x4xf32>
    %133 = vector.shape_cast %131 : vector<8x4xf32> to vector<8x4x1xf32>
    %c0_51 = arith.constant 0 : index
    %c0_52 = arith.constant 0 : index
    %134 = vector.load %arg14[%c0_51, %c0_52] : memref<1x16xf32, #tpu.memory_space<vmem>>, vector<1x16xf32>
    %135 = vector.shape_cast %134 : vector<1x16xf32> to vector<1x1x16xf32>
    %136 = vector.broadcast %133 : vector<8x4x1xf32> to vector<8x4x16xf32>
    %137 = vector.broadcast %135 : vector<1x1x16xf32> to vector<8x4x16xf32>
    %138 = arith.mulf %136, %137 : vector<8x4x16xf32>
    %139 = vector.shape_cast %132 : vector<8x4xf32> to vector<8x4x1xf32>
    %c0_53 = arith.constant 0 : index
    %c0_54 = arith.constant 0 : index
    %140 = vector.load %arg15[%c0_53, %c0_54] : memref<1x16xf32, #tpu.memory_space<vmem>>, vector<1x16xf32>
    %141 = vector.shape_cast %140 : vector<1x16xf32> to vector<1x1x16xf32>
    %142 = vector.broadcast %139 : vector<8x4x1xf32> to vector<8x4x16xf32>
    %143 = vector.broadcast %141 : vector<1x1x16xf32> to vector<8x4x16xf32>
    %144 = arith.mulf %142, %143 : vector<8x4x16xf32>
    %145 = arith.addf %138, %144 : vector<8x4x16xf32>
    %c0_55 = arith.constant 0 : index
    %c0_56 = arith.constant 0 : index
    %146 = vector.load %arg16[%c0_55, %c0_56] : memref<1x16xf32, #tpu.memory_space<vmem>>, vector<1x16xf32>
    %147 = vector.shape_cast %146 : vector<1x16xf32> to vector<1x1x16xf32>
    %148 = vector.broadcast %147 : vector<1x1x16xf32> to vector<8x4x16xf32>
    %149 = arith.addf %145, %148 : vector<8x4x16xf32>
    %cst_57 = arith.constant 0.000000e+00 : f32
    %150 = vector.broadcast %cst_57 : f32 to vector<8x4x16xf32>
    %151 = arith.maximumf %149, %150 : vector<8x4x16xf32>
    %c0_58 = arith.constant 0 : index
    %c0_59 = arith.constant 0 : index
    %152 = vector.load %arg17[%c0_58, %c0_59] : memref<1x16xf32, #tpu.memory_space<vmem>>, vector<1x16xf32>
    %153 = vector.shape_cast %152 : vector<1x16xf32> to vector<1x1x16xf32>
    %154 = vector.broadcast %153 : vector<1x1x16xf32> to vector<8x4x16xf32>
    %155 = arith.mulf %151, %154 : vector<8x4x16xf32>
    %cst_60 = arith.constant dense<0.000000e+00> : vector<8x4xf32>
    %156 = vector.multi_reduction <add>, %155, %cst_60 [2] : vector<8x4x16xf32> to vector<8x4xf32>
    %c0_61 = arith.constant 0 : index
    %c0_62 = arith.constant 0 : index
    %157 = vector.load %arg18[%c0_61, %c0_62] : memref<1x1xf32, #tpu.memory_space<vmem>>, vector<1x1xf32>
    %158 = vector.broadcast %157 : vector<1x1xf32> to vector<8x4xf32>
    %159 = arith.addf %156, %158 : vector<8x4xf32>
    %c0_63 = arith.constant 0 : index
    %c0_64 = arith.constant 0 : index
    %160 = vector.load %arg3[%c0_63, %c0_64] : memref<8x4xi32, #tpu.memory_space<vmem>>, vector<8x4xi32>
    %c0_i32 = arith.constant 0 : i32
    %161 = vector.broadcast %c0_i32 : i32 to vector<8x4xi32>
    %162 = arith.cmpi sgt, %160, %161 : vector<8x4xi32>
    %cst_65 = arith.constant -1.000000e+04 : f32
    %163 = vector.broadcast %cst_65 : f32 to vector<8x4xf32>
    %164 = arith.select %162, %159, %163 : vector<8x4xi1>, vector<8x4xf32>
    %c0_66 = arith.constant 0 : index
    %c0_67 = arith.constant 0 : index
    %165 = vector.load %arg20[%c0_66, %c0_67] : memref<8x4xf32, #tpu.memory_space<vmem>>, vector<8x4xf32>
    tpu.vector_store %arg20[%c0_66, %c0_67], %164 {strides = array<i32>} : memref<8x4xf32, #tpu.memory_space<vmem>>, vector<8x4xf32>,
    %cst_68 = arith.constant 0.000000e+00 : f32
    %166 = vector.broadcast %cst_68 : f32 to vector<8x4xf32>
    %167 = arith.cmpf olt, %164, %166 : vector<8x4xf32>
    %cst_69 = arith.constant -1.000000e+04 : f32
    %168 = vector.broadcast %cst_69 : f32 to vector<8x4xf32>
    %169 = arith.select %167, %168, %164 : vector<8x4xi1>, vector<8x4xf32>
    %cst_70 = arith.constant dense<0xFF800000> : vector<8xf32>
    %170 = vector.multi_reduction <maximumf>, %169, %cst_70 [1] : vector<8x4xf32> to vector<8xf32>
    %171 = vector.shape_cast %170 : vector<8xf32> to vector<8x1xf32>
    %172 = vector.broadcast %171 : vector<8x1xf32> to vector<8x4xf32>
    %173 = arith.subf %169, %172 : vector<8x4xf32>
    %174 = math.exp %173 : vector<8x4xf32>
    %cst_71 = arith.constant dense<0.000000e+00> : vector<8xf32>
    %175 = vector.multi_reduction <add>, %174, %cst_71 [1] : vector<8x4xf32> to vector<8xf32>
    %176 = vector.shape_cast %175 : vector<8xf32> to vector<8x1xf32>
    %177 = tpu.reciprocal %176 {approx = true} : vector<8x1xf32> -> vector<8x1xf32>
    %178 = vector.broadcast %177 : vector<8x1xf32> to vector<8x4xf32>
    %179 = arith.mulf %174, %178 : vector<8x4xf32>
    %180 = vector.extract_strided_slice %179 {offsets = [0, 0], sizes = [8, 1], strides = [1, 1]} : vector<8x4xf32> to vector<8x1xf32>
    %181 = vector.extract_strided_slice %108 {offsets = [0, 0, 0], sizes = [1, 8, 128], strides = [1, 1, 1]} : vector<4x8x128xf32> to vector<1x8x128xf32>
    %182 = vector.shape_cast %181 : vector<1x8x128xf32> to vector<8x128xf32>
    %183 = vector.broadcast %180 : vector<8x1xf32> to vector<8x128xf32>
    %184 = arith.mulf %183, %182 : vector<8x128xf32>
    %185 = vector.extract_strided_slice %179 {offsets = [0, 1], sizes = [8, 1], strides = [1, 1]} : vector<8x4xf32> to vector<8x1xf32>
    %186 = vector.extract_strided_slice %108 {offsets = [1, 0, 0], sizes = [1, 8, 128], strides = [1, 1, 1]} : vector<4x8x128xf32> to vector<1x8x128xf32>
    %187 = vector.shape_cast %186 : vector<1x8x128xf32> to vector<8x128xf32>
    %188 = vector.broadcast %185 : vector<8x1xf32> to vector<8x128xf32>
    %189 = arith.mulf %188, %187 : vector<8x128xf32>
    %190 = arith.addf %184, %189 : vector<8x128xf32>
    %191 = vector.extract_strided_slice %179 {offsets = [0, 2], sizes = [8, 1], strides = [1, 1]} : vector<8x4xf32> to vector<8x1xf32>
    %192 = vector.extract_strided_slice %108 {offsets = [2, 0, 0], sizes = [1, 8, 128], strides = [1, 1, 1]} : vector<4x8x128xf32> to vector<1x8x128xf32>
    %193 = vector.shape_cast %192 : vector<1x8x128xf32> to vector<8x128xf32>
    %194 = vector.broadcast %191 : vector<8x1xf32> to vector<8x128xf32>
    %195 = arith.mulf %194, %193 : vector<8x128xf32>
    %196 = arith.addf %190, %195 : vector<8x128xf32>
    %197 = vector.extract_strided_slice %179 {offsets = [0, 3], sizes = [8, 1], strides = [1, 1]} : vector<8x4xf32> to vector<8x1xf32>
    %198 = vector.extract_strided_slice %108 {offsets = [3, 0, 0], sizes = [1, 8, 128], strides = [1, 1, 1]} : vector<4x8x128xf32> to vector<1x8x128xf32>
    %199 = vector.shape_cast %198 : vector<1x8x128xf32> to vector<8x128xf32>
    %200 = vector.broadcast %197 : vector<8x1xf32> to vector<8x128xf32>
    %201 = arith.mulf %200, %199 : vector<8x128xf32>
    %202 = arith.addf %196, %201 : vector<8x128xf32>
    %203 = arith.extui %167 : vector<8x4xi1> to vector<8x4xi32>
    %cst_72 = arith.constant dense<0> : vector<8xi32>
    %204 = vector.multi_reduction <add>, %203, %cst_72 [1] : vector<8x4xi32> to vector<8xi32>
    %205 = vector.shape_cast %204 : vector<8xi32> to vector<8x1xi32>
    %c4_i32 = arith.constant 4 : i32
    %206 = vector.broadcast %c4_i32 : i32 to vector<8x1xi32>
    %207 = arith.cmpi eq, %205, %206 : vector<8x1xi32>
    %c0_73 = arith.constant 0 : index
    %c0_74 = arith.constant 0 : index
    %208 = vector.load %arg19[%c0_73, %c0_74] : memref<1x128xf32, #tpu.memory_space<vmem>>, vector<1x128xf32>
    %209 = vector.shape_cast %207 : vector<8x1xi1> to vector<8x1xi1>
    %210 = vector.broadcast %209 : vector<8x1xi1> to vector<8x128xi1>
    %211 = vector.shape_cast %208 : vector<1x128xf32> to vector<1x128xf32>
    %212 = vector.broadcast %211 : vector<1x128xf32> to vector<8x128xf32>
    %213 = arith.select %210, %212, %202 : vector<8x128xi1>, vector<8x128xf32>
    %c0_75 = arith.constant 0 : index
    %c0_76 = arith.constant 0 : index
    %214 = vector.load %arg21[%c0_75, %c0_76] : memref<8x128xf32, #tpu.memory_space<vmem>>, vector<8x128xf32>
    tpu.vector_store %arg21[%c0_75, %c0_76], %213 {strides = array<i32>} : memref<8x128xf32, #tpu.memory_space<vmem>>, vector<8x128xf32>,
    return
  }
  func.func @transform_0(%arg0: i32) -> (i32, i32) {
    %c0_i32 = arith.constant 0 : i32
    %c0_i32_0 = arith.constant 0 : i32
    return %arg0, %c0_i32 : i32, i32
  }
  func.func @transform_1(%arg0: i32) -> (i32, i32) {
    %c0_i32 = arith.constant 0 : i32
    %c0_i32_0 = arith.constant 0 : i32
    return %arg0, %c0_i32 : i32, i32
  }
  func.func @transform_2(%arg0: i32) -> (i32, i32) {
    %c0_i32 = arith.constant 0 : i32
    %c0_i32_0 = arith.constant 0 : i32
    return %arg0, %c0_i32 : i32, i32
  }
  func.func @transform_3(%arg0: i32) -> (i32, i32) {
    %c0_i32 = arith.constant 0 : i32
    %c0_i32_0 = arith.constant 0 : i32
    return %arg0, %c0_i32 : i32, i32
  }
  func.func @transform_4(%arg0: i32) -> (i32, i32, i32) {
    %c0_i32 = arith.constant 0 : i32
    %c0_i32_0 = arith.constant 0 : i32
    %c0_i32_1 = arith.constant 0 : i32
    return %c0_i32, %arg0, %c0_i32_0 : i32, i32, i32
  }
  func.func @transform_5(%arg0: i32) -> (i32, i32) {
    %c0_i32 = arith.constant 0 : i32
    %c0_i32_0 = arith.constant 0 : i32
    %c0_i32_1 = arith.constant 0 : i32
    return %c0_i32, %c0_i32_0 : i32, i32
  }
  func.func @transform_6(%arg0: i32) -> (i32, i32) {
    %c0_i32 = arith.constant 0 : i32
    %c0_i32_0 = arith.constant 0 : i32
    %c0_i32_1 = arith.constant 0 : i32
    return %c0_i32, %c0_i32_0 : i32, i32
  }
  func.func @transform_7(%arg0: i32) -> (i32, i32) {
    %c0_i32 = arith.constant 0 : i32
    %c0_i32_0 = arith.constant 0 : i32
    %c0_i32_1 = arith.constant 0 : i32
    return %c0_i32, %c0_i32_0 : i32, i32
  }
  func.func @transform_8(%arg0: i32) -> (i32, i32) {
    %c0_i32 = arith.constant 0 : i32
    %c0_i32_0 = arith.constant 0 : i32
    %c0_i32_1 = arith.constant 0 : i32
    return %c0_i32, %c0_i32_0 : i32, i32
  }
  func.func @transform_9(%arg0: i32) -> (i32, i32) {
    %c0_i32 = arith.constant 0 : i32
    %c0_i32_0 = arith.constant 0 : i32
    %c0_i32_1 = arith.constant 0 : i32
    return %c0_i32, %c0_i32_0 : i32, i32
  }
  func.func @transform_10(%arg0: i32) -> (i32, i32) {
    %c0_i32 = arith.constant 0 : i32
    %c0_i32_0 = arith.constant 0 : i32
    %c0_i32_1 = arith.constant 0 : i32
    return %c0_i32, %c0_i32_0 : i32, i32
  }
  func.func @transform_11(%arg0: i32) -> (i32, i32) {
    %c0_i32 = arith.constant 0 : i32
    %c0_i32_0 = arith.constant 0 : i32
    %c0_i32_1 = arith.constant 0 : i32
    return %c0_i32, %c0_i32_0 : i32, i32
  }
  func.func @transform_12(%arg0: i32) -> (i32, i32) {
    %c0_i32 = arith.constant 0 : i32
    %c0_i32_0 = arith.constant 0 : i32
    %c0_i32_1 = arith.constant 0 : i32
    return %c0_i32, %c0_i32_0 : i32, i32
  }
  func.func @transform_13(%arg0: i32) -> (i32, i32) {
    %c0_i32 = arith.constant 0 : i32
    %c0_i32_0 = arith.constant 0 : i32
    %c0_i32_1 = arith.constant 0 : i32
    return %c0_i32, %c0_i32_0 : i32, i32
  }
  func.func @transform_14(%arg0: i32) -> (i32, i32) {
    %c0_i32 = arith.constant 0 : i32
    %c0_i32_0 = arith.constant 0 : i32
    %c0_i32_1 = arith.constant 0 : i32
    return %c0_i32, %c0_i32_0 : i32, i32
  }
  func.func @transform_15(%arg0: i32) -> (i32, i32) {
    %c0_i32 = arith.constant 0 : i32
    %c0_i32_0 = arith.constant 0 : i32
    %c0_i32_1 = arith.constant 0 : i32
    return %c0_i32, %c0_i32_0 : i32, i32
  }
  func.func @transform_16(%arg0: i32) -> (i32, i32) {
    %c0_i32 = arith.constant 0 : i32
    %c0_i32_0 = arith.constant 0 : i32
    %c0_i32_1 = arith.constant 0 : i32
    return %c0_i32, %c0_i32_0 : i32, i32
  }
  func.func @transform_17(%arg0: i32) -> (i32, i32) {
    %c0_i32 = arith.constant 0 : i32
    %c0_i32_0 = arith.constant 0 : i32
    %c0_i32_1 = arith.constant 0 : i32
    return %c0_i32, %c0_i32_0 : i32, i32
  }
  func.func @transform_18(%arg0: i32) -> (i32, i32) {
    %c0_i32 = arith.constant 0 : i32
    %c0_i32_0 = arith.constant 0 : i32
    %c0_i32_1 = arith.constant 0 : i32
    return %c0_i32, %c0_i32_0 : i32, i32
  }
  func.func @transform_19(%arg0: i32) -> (i32, i32) {
    %c0_i32 = arith.constant 0 : i32
    %c0_i32_0 = arith.constant 0 : i32
    return %arg0, %c0_i32 : i32, i32
  }
  func.func @transform_20(%arg0: i32) -> (i32, i32) {
    %c0_i32 = arith.constant 0 : i32
    %c0_i32_0 = arith.constant 0 : i32
    return %arg0, %c0_i32 : i32, i32
  }
  func.func @transform_21(%arg0: i32) -> (i32, i32) {
    %c0_i32 = arith.constant 0 : i32
    %c0_i32_0 = arith.constant 0 : i32
    return %arg0, %c0_i32 : i32, i32
  }
  func.func @transform_22(%arg0: i32) -> (i32, i32) {
    %c0_i32 = arith.constant 0 : i32
    %c0_i32_0 = arith.constant 0 : i32
    return %arg0, %c0_i32 : i32, i32
  }
}

</mosaic_0001>

<bundles_post_ra>
// kernel: tpu_custom_call.1
= control target key start
LH: loop header
LB: loop body
LE: loop exit
PB: predicated region body
PF: predicated region fallthrough
CT: control target
= control target key end

     0   :  { %s2559_s0 = inlined_call_operand.vmem [shape: bf16[32,32], index: 0, kind: input, shape index: {}]   ;;  %s2560_s1 = inlined_call_operand.vmem [shape: s32[16,2], index: 1, kind: input, shape index: {}]   ;;  %s2561_s2 = inlined_call_operand.vmem [shape: s32[16,4], index: 2, kind: input, shape index: {}]   ;;  %s2562_s3 = inlined_call_operand.vmem [shape: f32[16,4], index: 3, kind: input, shape index: {}]   ;;  %s2563_s4 = inlined_call_operand.hbm [shape: f32[4,16,128], index: 4, kind: input, shape index: {}]   ;;  %s2564_s5 = inlined_call_operand.vmem [shape: bf16[32,128], index: 5, kind: input, shape index: {}]   ;;  %s2565_s6 = inlined_call_operand.vmem [shape: f32[1,128], index: 6, kind: input, shape index: {}]   ;;  %s2566_s7 = inlined_call_operand.vmem [shape: bf16[1,32], index: 7, kind: input, shape index: {}]   ;;  %s2567_s8 = inlined_call_operand.<no memory space> [shape: f32[1,1], index: 8, kind: input, shape index: {}]   ;;  %s2568_s9 = inlined_call_operand.vmem [shape: f32[1,128], index: 9, kind: input, shape index: {}]   ;;  %s2569_s10 = inlined_call_operand.vmem [shape: f32[1,128], index: 10, kind: input, shape index: {}]   ;;  %s2570_s11 = inlined_call_operand.vmem [shape: f32[1,128], index: 11, kind: input, shape index: {}]   ;;  %s2571_s12 = inlined_call_operand.vmem [shape: f32[1,128], index: 12, kind: input, shape index: {}]   ;;  %s2572_s13 = inlined_call_operand.vmem [shape: f32[1,16], index: 13, kind: input, shape index: {}]   ;;  %s2573_s14 = inlined_call_operand.vmem [shape: f32[1,16], index: 14, kind: input, shape index: {}]   ;;  %s2574_s15 = inlined_call_operand.vmem [shape: f32[1,16], index: 15, kind: input, shape index: {}]   ;;  %s2575_s16 = inlined_call_operand.vmem [shape: f32[1,16], index: 16, kind: input, shape index: {}]   ;;  %s2576_s18 = inlined_call_operand.vmem [shape: f32[1,128], index: 18, kind: input, shape index: {}]   ;;  %s2577_s19 = inlined_call_operand.vmem [shape: f32[16,4], index: 19, kind: output, shape index: {0}]   ;;  %s2578_s20 = inlined_call_operand.hbm [shape: f32[16,128], index: 20, kind: output, shape index: {1}]   ;;  %s2579_s21 = inlined_call_operand.hbm [shape: f32[16,128], index: 21, kind: output, shape index: {2}]   ;;  %s2580_s22 = inlined_call_operand.hbm [shape: f32[32,128], index: 22, kind: output, shape index: {3}]   ;;  %s2581_s17 = inlined_call_operand.<no memory space> [shape: f32[1,1], index: 17, kind: input, shape index: {}]  }
   0x1   :  { %2595 = sst [smem:[#allocation19_spill]] %s2559_s0  ;;  %v28_v0 = vstv %s2567_s8  ;;  %v30_v1 = vstv %s2581_s17 }
   0x2   :  { %2596 = sst [smem:[#allocation20_spill]] %s2560_s1  ;;  %29 = vst [vmem:[#allocation2] sm:$0x1] %v28_v0 }
   0x3   :  { %2597 = sst [smem:[#allocation21_spill]] %s2561_s2  ;;  %31 = vst [vmem:[#allocation3] sm:$0x1] %v30_v1 }
   0x4   :  { %2598 = sst [smem:[#allocation22_spill]] %s2562_s3 }
   0x5   :  { %2599 = sst [smem:[#allocation23_spill]] %s2563_s4 }
   0x6   :  { %2600 = sst [smem:[#allocation24_spill]] %s2564_s5 }
   0x7   :  { %2601 = sst [smem:[#allocation25_spill]] %s2565_s6 }
   0x8   :  { %2602 = sst [smem:[#allocation26_spill]] %s2566_s7 }
   0x9   :  { %2603 = sst [smem:[#allocation27_spill]] %s2576_s18 }
   0xa   :  { %2604 = sst [smem:[#allocation28_spill]] %s2578_s20 }
   0xb   :  { %2605 = sst [smem:[#allocation29_spill]] %s2580_s22 }
   0xc   :  { %32 = vsyncpa [#allocation5], 0 }
   0xd   :  { %34 = vsyncpa [#allocation5 + $0x1], 0 }
   0xe   :  { %35 = vsyncpa [#allocation6], 0 }
   0xf   :  { %37 = vsyncpa [#allocation6 + $0x1], 0 }
  0x10   :  { %38 = vsyncpa [#allocation9], 0 }
  0x11   :  { %40 = vsyncpa [#allocation9 + $0x1], 0  ;;  %s2154_s4 = smov 0   ;;  %s2156_s0 = smov 0  }
  0x12   :  { %s2158_s23 = smov 0   ;;  %s2160_s1 = smov 0  }
  0x13 LB: > { %2606 = sst [smem:[#allocation14_spill]] %s2009_s4  ;;  %s2175_s8 = sadd.s32 4294967295, %s2021_s1   ;;  %s2021_s1 = sphi %s2160_s1, %s2638_s1   ;;  %s2017_s23 = sphi %s2158_s23, %s2640_s23   ;;  %s2013_s0 = sphi %s2156_s0, %s2642_s0   ;;  %s2009_s4 = sphi %s2154_s4, %s2641_s4  }
  0x14   : > { %2607 = sst [smem:[#allocation15_spill]] %s2017_s23  ;;  %s2587_s17 = sadd.s32 4294967294, %s2021_s1  }
  0x15   : > { %s2179_s5 = sadd.s32 1, %s2021_s1   ;;  %s157_s24 = sadd.s32 1, %s2017_s23 }
  0x16   : > { %2608 = sst [smem:[#allocation16_spill]] %s2179_s5  ;;  %s154_s6 = ssub.s32 %s2021_s1, %s2179_s5 }
  0x17   : > { %p164_p0 = scmp.ne.s32.totalorder %s2017_s23, %s2013_s0  ;;  %p155_p1 = scmp.eq.s32.totalorder %s154_s6, 0 }
  0x18   : > { %p165_p2 = scmp.eq.s32.totalorder %s2021_s1, 0  ;;  %p170_p3 = scmp.ne.s32.totalorder %s2013_s0, %s2009_s4 }
  0x19   : > { %p171_p4 = scmp.eq.s32.totalorder %s2175_s8, 0  ;;  %p514_p7 = scmp.eq.s32.totalorder %s2175_s8, 1 }
  0x1a   : > { %s2191_s25 = scalar_select %p155_p1, %s2017_s23, %s157_s24  }
  0x1b   : > { %p2193_p5 = por %p165_p2, %p164_p0  ;;  %p2197_p6 = por %p171_p4, %p170_p3 }
  0x1c   : > { %2609 = sst [smem:[#allocation17_spill]] %s2191_s25  ;;  %p520_p8 = scmp.eq.s32.totalorder %s2587_s17, 1 }
  0x1d   : > { %p1708_p9 = scmp.ge.s32.totalorder %s2021_s1, 2  ;;  %p1780_p10 = scmp.lt.s32.totalorder %s2021_s1, 2 }
  0x1e   : > { %p2206_p11 = por %p514_p7, %p164_p0  ;;  %p2210_p12 = por %p520_p8, %p170_p3 }
  0x1f   : > { %s664_s28 = sand.u32 1, %s2017_s23   ;;  %s1710_s29 = sshll.u32 %s2021_s1, 3 }
  0x20   : > { %s2613_s3 = scalar_select %p2210_p12, 1, 0 }
  0x21   : > { %s1709_s30 = sshll.u32 %s664_s28, 5  ;;  %s2615_s25 = sld [smem:[#allocation23_spill]] }
  0x22   : > { %2614 = sst [smem:[#allocation18_spill]] %s2613_s3  ;;  %s668_s18 = scalar_lea.vmem [#allocation4], %s1709_s30 }
  0x23   : > { %s675_s17 = sshll.u32 %s668_s18, 4  ;;  %p2221_p13 = pnand %p1780_p10, %p2193_p5  ;;  %s676_s17 = int_to_ptr.vmem [resolvable:$true] %s675_s17 }
  0x24   : > { %p1711_p0 = scmp.ge.s32.totalorder %s2021_s1, 1  ;;  %s665_s3 = scalar_lea.sflag [#allocation5], %s664_s28 }
  0x25   : > { %p1869_p2 = pneg %p2221_p13 }
  0x27   : > { %s672_s5 = scalar_lea.hbm %s2615_s25, %s1710_s29  ;;  %s1872_s29 = scalar_lea.hbm %s2615_s25, 64 }
  0x28   : > { %s673_s4 = sshll.u32 %s672_s5, 4  ;;  %s674_s4 = int_to_ptr.hbm [resolvable:$true] %s673_s4 }
  0x29   : > { %s1865_s23 = sshra.s32 %s674_s4, 4  ;;  %s1866_s23 = int_to_ptr.hbm [resolvable:$true] %s1865_s23 }
  0x2a   : > { %s1867_s22 = scalar_lea.hbm %s1866_s23, 32  ;;  %p1873_p5 = scmp.lt.s32.totalorder %s1866_s23, %s2615_s25 }
  0x2b   : > { %p1868_p1 = scmp.ne.s32.totalorder %s1866_s23, %s1867_s22  ;;  %p1874_p7 = scmp.lt.s32.totalorder %s1872_s29, %s1867_s22 }
  0x2d   : > { %p1870_p3 = pnand %p1869_p2, %p1868_p1  ;;  %p1875_p8 = por %p1874_p7, %p1873_p5 }
  0x2f   : > { %p1871_p4 = pneg %p1870_p3 }
  0x31   : > { %p1876_p10 = pnand %p1875_p8, %p1871_p4 }
  0x33   : > { %1879 = shalt.err (!%p1876_p10)
}
  0x34   : > { %s2023_s28 = smov 256   ;;  %s2024_s24 = smov 128  }
  0x35   : > { %s2025_s6 = smov 8   ;;  %p683_p1 = scmp.lt.s32.totalorder %s2021_s1, 3 }
  0x36   : > { %1769 = dma.hbm_to_vmem [thread:$0]  (!%p2221_p13), %s674_s4, 512, %s676_s17, %s665_s3, %s2023_s28, %s2024_s24, %s2025_s6  }
  0x37   : > { %p684_p2 = pnand %p1711_p0, %p683_p1 }
  0x38   : > { %s2240_s5 = sand.u32 (!%p684_p2), 1, %s2013_s0  }
  0x39   : > { %687 = sbr.rel (%p684_p2) target bundleno = 1720 (0x6b8), region = 96  ;;  %s1712_s22 = sshll.u32 (!%p684_p2), %s2240_s5, 5 }
  0x3a   : > { %s690_s23 = scalar_lea.sflag (!%p684_p2), [#allocation5], %s2240_s5  ;;  %s2244_s18 = scalar_lea.vmem (!%p684_p2), [#allocation4], %s1712_s22 }
  0x3e   : > { %1996 = dma.done.wait (%p2197_p6), %s690_s23, 512  }
  0x3f   : > { %1998 = vsyncadd (%p2197_p6), %s690_s23, 4294966784  ;;  %s1716_s20 = sshll.u32 %s2175_s8, 1  ;;  %p792_p13 = scmp.lt.s32.totalorder %s2175_s8, 1  ;;  %v2026_v2 = vmov 0   ;;  %v2027_v3 = vmov 1   ;;  %vm842_vm0 = vcmask 261120   ;;  %v810_v15 = vlaneseq }
  0x40   : > { %1824 = vset.pattern.permute.xlu0 %v2026_v2  ;;  %p787_p0 = scmp.lt.s32.totalorder %s1716_s20, 3  ;;  %1825 = vset.pattern.permute.xlu1 %v2027_v3  ;;  %s2617_s26 = sld [smem:[#allocation20_spill]]  ;;  %v865_v4 = vld [vmem:[#allocation2] sm:$0x1]  ;;  %v2028_v10 = vmov 0.0   ;;  %vm915_vm6 = vcmask 130048  }
  0x41   : > { %s793_s4 = scalar_select %p792_p13, %s2175_s8, 1  ;;  %868 = vperm.xlu0 %1824, %v865_v4   ;;  %v2279_v16 = vand.u32 127, %v810_v15  ;;  %v1001_v35 = vld [vmem:[%s2244_s18] sm:$0xff]  ;;  %v1002_v37 = vld [vmem:[%s2244_s18 + $0x8] sm:$0xff]  ;;  %v2294_v38 = vld [vmem:[%s2244_s18 + $0x10] sm:$0xff] }
  0x42   : > { %s2644_s20 = smov (!%p787_p0, %s1716_s20), 3  ;;  %s2618_s6 = sld [smem:[#allocation19_spill]]  ;;  %v1004_v43 = vld [vmem:[%s2244_s18 + $0x18] sm:$0xff] }
  0x43   : > { %s2255_s17 = sshll.u32 %s793_s4, 3  ;;  %s1717_s3 = sshll.u32 %s2644_s20, 2  ;;  %vm812_vm12 = vcmp.lt.s32.totalorder %v2279_v16, 32 }
  0x44   : > { %s2619_s7 = sld [smem:[#allocation26_spill]]  ;;  %v1722_v62 = vsel %vm812_vm12, 1.0, %v2028_v10  ;;  %s2592_s23 = sshll.u32 %s2240_s5, 3  ;;  %vm1117_vm12 = vcmask 7168  }
  0x45   : > { %s2620_s2 = sld [smem:[#allocation24_spill]]  ;;  %s807_s28 = scalar_lea.vmem %s2577_s19, %s2255_s17 }
  0x46   : > { %s795_s30 = scalar_lea.vmem %s2617_s26, %s2255_s17  ;;  %s2622_s20 = sld [smem:[#allocation22_spill]] }
  0x47   : > { %v896_v6 = vld [vmem:[%s795_s30] sm:$0xff]  ;;  %s1715_s30 = sshll.u32 %s2240_s5, 4 }
  0x48   : > { %s2264_s22 = scalar_lea.vmem %s2618_s6, %s1717_s3  ;;  %903 = vperm.xlu1 %1825, %v896_v6   ;;  %vm897_vm1 = vcmp.gt.s32.totalorder %v896_v6, 4294967295  ;;  %s2621_s6 = sld [smem:[#allocation25_spill]] }
  0x49   : > { %v1756_v5 = vld [vmem:[%s2264_s22] sm:$0xff]  ;;  %v907_v9 = vsel %vm897_vm1, 1, %v2026_v2  ;;  %899 = vperm.xlu0 %1824, %v896_v6   ;;  %v1743_v11 = vsel %vm897_vm1, 1.0, %v2028_v10  ;;  %s2629_s3 = sld [smem:[#allocation21_spill]] }
  0x4a   : > { %v881_v7 = vsel %vm842_vm0, %v1756_v5, 0  ;;  %v862_v8 = vld [vmem:[%s2619_s7] sm:$0x1] }
  0x4b   : > { %890 = vmatpush.bf16.xpose.msra.mxu1 %v881_v7  ;;  %v1755_v12 = vld [vmem:[%s2620_s2 + $0x8] sm:$0xff]  ;;  %v1754_v26 = vld [vmem:[%s2620_s2] sm:$0xff] }
  0x4c   : > { %852 = vmatpush.bf16.msra.mxu0 %v1755_v12  ;;  %v1753_v27 = vld [vmem:[%s2264_s22] sm:$0xff]  ;;  %s2302_s22 = scalar_lea.vmem [#allocation10], %s1715_s30  ;;  %s803_s4 = scalar_lea.vmem %s2622_s20, %s2255_s17 }
  0x4d   : > { %s2391_s20 = scalar_lea.vmem [#allocation8], %s2592_s23  ;;  %s1757_s30 = sshll.u32 %s2175_s8, 4 }
  0x4e   : > { %v1836_v39 = vld [vmem:[%s2621_s6] ss:$0 sm:$0xff] }
  0x4f   : > { %s799_s29 = scalar_lea.vmem %s2629_s3, %s2255_s17  ;;  %s2594_s17 = sshll.u32 %s2175_s8, 3 }
  0x50   : > { %1826 = vset.pattern.permute.xlu1 %v2026_v2  ;;  %853 = vmatpush.bf16.msra.mxu0 %v1754_v26  ;;  %s1479_s18 = scalar_lea.hbm %s2579_s21, %s2594_s17  ;;  %s1481_s3 = sshll.u32 %s2391_s20, 4  ;;  %s1482_s3 = int_to_ptr.vmem [resolvable:$true] %s1481_s3 }
  0x51   : > { %909 = vperm.xlu1 %1826, %v907_v9   ;;  %965 = vperm.xlu0 %1824, %v1743_v11   ;;  %s1483_s26 = sshll.u32 %s1479_s18, 4  ;;  %s1484_s26 = int_to_ptr.hbm [resolvable:$true] %s1483_s26 }
  0x52   : > { %1740 = vmatmul.msk.bf16.vlgmr.msra.gmra.mxu1 %vm842_vm0, %v862_v8  ;;  %s1909_s23 = sshra.s32 %s1484_s26, 4  ;;  %s1910_s23 = int_to_ptr.hbm [resolvable:$true] %s1909_s23 }
  0x53   : > { %1735 = vmatmul.msk.bf16.vlgmr.msra.gmra.mxu0 %vm842_vm0, %v1753_v27  ;;  %s1911_s2 = scalar_lea.hbm %s1910_s23, 8  ;;  %p1916_p5 = scmp.lt.s32.totalorder %s1910_s23, %s2579_s21 }
  0x54   : > { %p1912_p6 = scmp.ne.s32.totalorder %s1910_s23, %s1911_s2 }
  0x56   : > { %p1913_p3 = pnand %p1912_p6, %p2206_p11 }
  0x58   : > { %p1914_p4 = pneg %p1913_p3 }
  0x7b   : > { %1009 = vadd.xlane.f32.xlu0 %v1002_v37 }
  0xb3   : > { %v869_v13 = vpop.permute.xlu0 %868 }
  0xb4   : > { %v871_v19 = vperm.slane %v869_v13, 0 }
  0xba   : > { %v904_v14 = vpop.permute.xlu1 %903 }
  0xbb   : > { %v900_v17 = vpop.permute.xlu0 %899  ;;  %vm905_vm2 = vcmp.le.s32.totalorder %v2279_v16, %v904_v14 }
  0xbc   : > { %vm901_vm3 = vcmp.ge.s32.totalorder %v2279_v16, %v900_v17 }
  0xbd   : > { %vm906_vm4 = vmand %vm901_vm3, %vm905_vm2 }
  0xc3   : > { %v910_v18 = vpop.permute.xlu1 %909  ;;  %v966_v1 = vpop.permute.xlu0 %965 }
  0xc4   : > { %vm911_vm5 = vcmp.eq.s32.totalorder %v910_v18, 1 }
  0xc5   : > { %vm912_vm7 = vmand %vm906_vm4, %vm911_vm5 }
  0xc6   : > { %v1741_v32 = vsel %vm912_vm7, 1.0, %v2028_v10 }
  0xcf   : > { %v892_v20 = vpop.f32.mrf.mxu1 }
  0xd0   : > { %v893_v21 = vadd.f32 %v892_v20, %v871_v19  ;;  %v855_v36 = vpop.f32.mrf.mxu0 }
  0xd1   : > { %v856_v41 = vadd.f32 %v1836_v39, %v855_v36 }
  0xd2   : > { %v913_v22 = vperm.slane %v893_v21, 0 }
  0xd3   : > { %860 = vst [vmem:[%s2302_s22] sm:$0xff] %v856_v41 }
  0xd4   : > { %v914_v23 = vsel %vm912_vm7, %v913_v22, -1e+30 }
  0xd5   : > { %v916_v24 = vsel %vm915_vm6, %v914_v23, -inf }
  0xd6   : > { %917 = vmax.xlane.f32.xlu2 %v916_v24  ;;  %v1127_v24 = vshrl.u32 %v810_v15, 7 }
  0xd7   : > { %v894_v25 = vpop.f32.mrf.mxu1 }
  0xd8   : > { %v857_v40 = vpop.f32.mrf.mxu0  ;;  %1828 = vset.pattern.permute.xlu1 %v1127_v24  ;;  %1827 = vset.pattern.permute.xlu0 %v1127_v24  ;;  %v2331_v25 = vld [vmem:[%s803_s4] sm:$0xff]  ;;  %s1446_s4 = sand.u32 1, %s2175_s8  }
  0xd9   : > { %v858_v42 = vadd.f32 %v1836_v39, %v857_v40  ;;  %1829 = vset.pattern.permute.xlu2 %v1127_v24  ;;  %v1207_v15 = vperm.slane %v2331_v25, 2  ;;  %v1228_v36 = vperm.slane %v2331_v25, 5 }
  0xdb   : > { %v945_v44 = vpack.c.bf16 %v858_v42, %v856_v41  ;;  %861 = vst [vmem:[%s2302_s22 + $0x8] sm:$0xff] %v858_v42 }
  0xdd   : > { %956 = vmatpush.bf16.msra.mxu2 %v945_v44 }
  0xee   : > { %v1010_v4 = vpop.xlane.xlu0 %1009 }
  0xef   : > { %v1016_v6 = vmul.f32 0.03125, %v1010_v4 }
  0xf1   : > { %v1020_v7 = vsub.f32 %v1002_v37, %v1016_v6 }
  0xf3   : > { %v2313_v8 = vmul.f32 %v1722_v62, %v1020_v7 }
  0xf5   : > { %v1028_v9 = vmul.f32 %v2313_v8, %v2313_v8 }
 0x149   : > { %v918_v28 = vpop.xlane.xlu2 %917 }
 0x14a   : > { %v919_v29 = vsub.f32 %v914_v23, %v918_v28  ;;  %v1200_v28 = vperm.slane %v2331_v25, 1 }
 0x14c   : > { %v920_v30 = vmul.f32 1.442695, %v919_v29  ;;  %v1193_v29 = vperm.slane %v2331_v25, 0 }
 0x14e   : > { %1847 = vpow2.f32 %v920_v30  ;;  %1198 = vperm.xlu0 %1827, %v1193_v29  }
 0x154   : > { %v1848_v31 = vpop.eup %1847 }
 0x155   : > { %v924_v33 = vmul.f32 %v1848_v31, %v1741_v32 }
 0x157   : > { %v925_v34 = vsel %vm915_vm6, %v924_v33, 0.0 }
 0x158   : > { %926 = vadd.xlane.f32.xlu2 %v925_v34  ;;  %v1214_v34 = vperm.slane %v2331_v25, 3 }
 0x160   : > { %1007 = vadd.xlane.f32.xlu2 %v1001_v35 }
 0x168   : > { %1011 = vadd.xlane.f32.xlu2 %v2294_v38 }
 0x170   : > { %1013 = vadd.xlane.f32.xlu2 %v1004_v43 }
 0x1cb   : > { %v927_v45 = vpop.xlane.xlu2 %926 }
 0x1cc   : > { %v928_v46 = vadd.f32 1e-30, %v927_v45 }
 0x1ce   : > { %1849 = vrcp.f32 %v928_v46  ;;  %v940_v50 = vand.u32 2147483648, %v928_v46  ;;  %v938_v52 = vand.u32 2147483647, %v928_v46  ;;  %vm934_vm9 = vweird.f32 %v928_v46 }
 0x1d0   : > { %v941_v54 = vor.u32 1.1754944e-38, %v940_v50  ;;  %vm939_vm11 = vcmp.eq.f32.partialorder %v938_v52, 8.507059e+37 }
 0x1d3   : > { %v1008_v59 = vpop.xlane.xlu2 %1007 }
 0x1d4   : > { %v1850_v47 = vpop.eup %1849  ;;  %v1015_v60 = vmul.f32 0.03125, %v1008_v59 }
 0x1d5   : > { %v930_v48 = vmul.f32 %v1850_v47, %v928_v46  ;;  %vm935_vm8 = vweird.f32 %v1850_v47 }
 0x1d6   : > { %vm936_vm10 = vmor %vm934_vm9, %vm935_vm8  ;;  %v1019_v61 = vsub.f32 %v1001_v35, %v1015_v60  ;;  %v1235_v35 = vperm.slane %v2331_v25, 6 }
 0x1d7   : > { %v931_v49 = vsub.f32 1.0, %v930_v48 }
 0x1d8   : > { %v2309_v63 = vmul.f32 %v1722_v62, %v1019_v61 }
 0x1d9   : > { %v932_v51 = vmul.f32 %v1850_v47, %v931_v49 }
 0x1da   : > { %v1027_v0 = vmul.f32 %v2309_v63, %v2309_v63 }
 0x1db   : > { %v933_v53 = vadd.f32 %v1850_v47, %v932_v51  ;;  %v1012_v5 = vpop.xlane.xlu2 %1011 }
 0x1dc   : > { %1031 = vadd.xlane.f32.xlu2 %v1027_v0  ;;  %v1017_v17 = vmul.f32 0.03125, %v1012_v5 }
 0x1dd   : > { %v937_v55 = vsel %vm936_vm10, %v1850_v47, %v933_v53 }
 0x1de   : > { %v942_v56 = vsel %vm939_vm11, %v941_v54, %v937_v55  ;;  %v1021_v18 = vsub.f32 %v2294_v38, %v1017_v17 }
 0x1df   : > { %v943_v57 = vmul.f32 %v942_v56, %v924_v33  ;;  %v1221_v33 = vperm.slane %v2331_v25, 4 }
 0x1e0   : > { %v2322_v21 = vmul.f32 %v1722_v62, %v1021_v18 }
 0x1e1   : > { %v944_v58 = vpack.c.bf16 %v943_v57, %v943_v57  ;;  %1226 = vperm.xlu0 %1827, %v1221_v33  }
 0x1e2   : > { %v1029_v22 = vmul.f32 %v2322_v21, %v2322_v21 }
 0x1e3   : > { %1742 = vmatmul.msk.bf16.vlgmr.msra.gmra.mxu2 %vm915_vm6, %v944_v58  ;;  %v1014_v11 = vpop.xlane.xlu2 %1013 }
 0x1e4   : > { %v1018_v12 = vmul.f32 0.03125, %v1014_v11  ;;  %1033 = vadd.xlane.f32.xlu2 %v1028_v9 }
 0x1e6   : > { %v1022_v10 = vsub.f32 %v1004_v43, %v1018_v12 }
 0x1e8   : > { %v2317_v13 = vmul.f32 %v1722_v62, %v1022_v10 }
 0x1ea   : > { %v1030_v14 = vmul.f32 %v2317_v13, %v2317_v13 }
 0x1ec   : > { %1037 = vadd.xlane.f32.xlu2 %v1030_v14 }
 0x24f   : > { %v1032_v37 = vpop.xlane.xlu2 %1031 }
 0x250   : > { %v1039_v40 = vmul.f32 0.03125, %v1032_v37  ;;  %v1837_v37 = vld [vmem:[%s2570_s11] ss:$0 sm:$0xff] }
 0x252   : > { %v1043_v43 = vadd.f32 1e-05, %v1039_v40 }
 0x254   : > { %1851 = vrsqrt.f32 %v1043_v43  ;;  %vm1053_vm13 = vweird.f32 %v1043_v43 }
 0x257   : > { %v1034_v38 = vpop.xlane.xlu2 %1033 }
 0x258   : > { %v1040_v41 = vmul.f32 0.03125, %v1034_v38 }
 0x25a   : > { %v1044_v44 = vadd.f32 1e-05, %v1040_v41  ;;  %v1852_v48 = vpop.eup %1851 }
 0x25b   : > { %v1048_v52 = vmul.f32 %v1852_v48, %v1043_v43  ;;  %vm1054_vm14 = vweird.f32 %v1852_v48 }
 0x25c   : > { %1853 = vrsqrt.f32 %v1044_v44  ;;  %vm1063_vm15 = vweird.f32 %v1044_v44  ;;  %vm2344_vm3 = vmor %vm1053_vm13, %vm1054_vm14  ;;  %vm1119_vm13 = vcmask 15360   ;;  %vm1121_vm14 = vcmask 23552  }
 0x25d   : > { %v1049_v55 = vmul.f32 %v1852_v48, %v1048_v52 }
 0x25f   : > { %v1038_v46 = vpop.xlane.xlu2 %1037  ;;  %v1050_v61 = vmul.f32 0.5, %v1049_v55  ;;  %v2397_v55 = vpop.permute.xlu0 %1198 }
 0x260   : > { %v1042_v47 = vmul.f32 0.03125, %v1038_v46 }
 0x261   : > { %v1051_v5 = vsub.f32 1.5, %v1050_v61 }
 0x262   : > { %v1046_v49 = vadd.f32 1e-05, %v1042_v47  ;;  %v1854_v50 = vpop.eup %1853 }
 0x263   : > { %v1058_v53 = vmul.f32 %v1854_v50, %v1044_v44  ;;  %vm1064_vm0 = vweird.f32 %v1854_v50  ;;  %v1052_v12 = vmul.f32 %v1852_v48, %v1051_v5 }
 0x264   : > { %vm2348_vm4 = vmor %vm1063_vm15, %vm1064_vm0  ;;  %vm1083_vm6 = vweird.f32 %v1046_v49  ;;  %vm1301_vm15 = vcmask 125952   ;;  %vm1359_vm0 = vcmask 1041409  }
 0x265   : > { %v1059_v56 = vmul.f32 %v1854_v50, %v1058_v53 }
 0x266   : > { %v958_v19 = vpop.f32.mrf.mxu2 }
 0x267   : > { %v968_v20 = vmul.f32 %v966_v1, %v958_v19  ;;  %v1060_v0 = vmul.f32 0.5, %v1059_v56 }
 0x269   : > { %971 = vadd.xlane.f32.xlu1 %v968_v20  ;;  %v1061_v6 = vsub.f32 1.5, %v1060_v0 }
 0x26b   : > { %v1062_v14 = vmul.f32 %v1854_v50, %v1061_v6 }
 0x26e   : > { %v960_v23 = vpop.f32.mrf.mxu2 }
 0x26f   : > { %v1056_v23 = vsel %vm2344_vm3, %v1852_v48, %v1052_v12  ;;  %v1242_v12 = vperm.slane %v2331_v25, 7  ;;  %v1841_v25 = vld [vmem:[%s2573_s14] ss:$0 sm:$0xff]  ;;  %vm1365_vm3 = vcmask 1044484  }
 0x271   : > { %1035 = vadd.xlane.f32.xlu1 %v1029_v22 }
 0x28a   : > { %1205 = vperm.xlu1 %1828, %v1200_v28  }
 0x292   : > { %1212 = vperm.xlu1 %1828, %v1207_v15  }
 0x29a   : > { %1219 = vperm.xlu1 %1828, %v1214_v34  }
 0x2a2   : > { %1240 = vperm.xlu1 %1828, %v1235_v35  }
 0x2dc   : > { %v972_v26 = vpop.xlane.xlu1 %971 }
 0x2dd   : > { %v973_v27 = vmul.f32 0.03125, %v972_v26 }
 0x2df   : > { %v974_v30 = vsub.f32 %v968_v20, %v973_v27  ;;  %v1066_v27 = vsel %vm2348_vm4, %v1854_v50, %v1062_v14  ;;  %vm1367_vm4 = vcmask 1045509  }
 0x2e0   : > { %v1088_v15 = vmul.f32 %v1066_v27, %v2313_v8 }
 0x2e1   : > { %v2335_v31 = vmul.f32 %v1722_v62, %v974_v30  ;;  %v1839_v30 = vld [vmem:[%s2568_s9] ss:$0 sm:$0xff] }
 0x2e2   : > { %v1095_v40 = vmul.f32 %v1839_v30, %v1088_v15 }
 0x2e3   : > { %v976_v32 = vmul.f32 %v2335_v31, %v2335_v31 }
 0x2e4   : > { %v1036_v39 = vpop.xlane.xlu1 %1035 }
 0x2e5   : > { %977 = vadd.xlane.f32.xlu2 %v976_v32  ;;  %v1041_v42 = vmul.f32 0.03125, %v1036_v39  ;;  %v1087_v32 = vmul.f32 %v1056_v23, %v2309_v63  ;;  %v1840_v63 = vld [vmem:[%s2569_s10] ss:$0 sm:$0xff] }
 0x2e6   : > { %v2381_v46 = vadd.f32 %v1840_v63, %v1095_v40 }
 0x2e7   : > { %v1045_v45 = vadd.f32 1e-05, %v1041_v42  ;;  %v1094_v8 = vmul.f32 %v1839_v30, %v1087_v32 }
 0x2e9   : > { %1855 = vrsqrt.f32 %v1045_v45  ;;  %vm1073_vm1 = vweird.f32 %v1045_v45  ;;  %v2379_v44 = vadd.f32 %v1840_v63, %v1094_v8 }
 0x2ea   : > { %1857 = vrsqrt.f32 %v1046_v49 }
 0x2ef   : > { %v1856_v51 = vpop.eup %1855 }
 0x2f0   : > { %v1068_v54 = vmul.f32 %v1856_v51, %v1045_v45  ;;  %v1858_v59 = vpop.eup %1857  ;;  %vm1074_vm2 = vweird.f32 %v1856_v51 }
 0x2f1   : > { %v1078_v1 = vmul.f32 %v1858_v59, %v1046_v49  ;;  %vm1075_vm5 = vmor %vm1073_vm1, %vm1074_vm2  ;;  %vm1084_vm7 = vweird.f32 %v1858_v59  ;;  %vm1361_vm1 = vcmask 1042434   ;;  %vm1363_vm2 = vcmask 1043459  }
 0x2f2   : > { %v1069_v57 = vmul.f32 %v1856_v51, %v1068_v54  ;;  %vm2362_vm9 = vmor %vm1083_vm6, %vm1084_vm7  ;;  %vm1371_vm6 = vcmask 1047559  }
 0x2f3   : > { %v1079_v7 = vmul.f32 %v1858_v59, %v1078_v1 }
 0x2f4   : > { %v1070_v4 = vmul.f32 0.5, %v1069_v57  ;;  %v2399_v57 = vpop.permute.xlu0 %1226 }
 0x2f5   : > { %v1080_v18 = vmul.f32 0.5, %v1079_v7 }
 0x2f6   : > { %v1071_v9 = vsub.f32 1.5, %v1070_v4 }
 0x2f7   : > { %v1081_v24 = vsub.f32 1.5, %v1080_v18 }
 0x2f8   : > { %v1072_v19 = vmul.f32 %v1856_v51, %v1071_v9 }
 0x2f9   : > { %v1082_v34 = vmul.f32 %v1858_v59, %v1081_v24 }
 0x2fa   : > { %v1076_v28 = vsel %vm1075_vm5, %v1856_v51, %v1072_v19  ;;  %vm1369_vm5 = vcmask 1046534  }
 0x2fb   : > { %v1089_v33 = vmul.f32 %v1076_v28, %v2322_v21  ;;  %v1838_v21 = vld [vmem:[%s2571_s12] ss:$0 sm:$0xff]  ;;  %v1086_v42 = vsel %vm2362_vm9, %v1858_v59, %v1082_v34 }
 0x2fc   : > { %v1090_v48 = vmul.f32 %v1086_v42, %v2317_v13  ;;  %v1206_v13 = vpop.permute.xlu1 %1205  ;;  %v2424_v28 = vld [vmem:[%s2575_s16] ss:$0 sm:$0xff] }
 0x2fd   : > { %1233 = vperm.xlu2 %1829, %v1228_v36   ;;  %v1096_v41 = vmul.f32 %v1839_v30, %v1089_v33  ;;  %v1254_v23 = vmul.f32 %v1841_v25, %v1206_v13  ;;  %v1253_v13 = vmul.f32 %v1841_v25, %v2397_v55 }
 0x2fe   : > { %v1097_v51 = vmul.f32 %v1839_v30, %v1090_v48 }
 0x2ff   : > { %v2383_v47 = vadd.f32 %v1840_v63, %v1096_v41 }
 0x300   : > { %v2394_v52 = vadd.f32 %v1840_v63, %v1097_v51 }
 0x304   : > { %v1213_v54 = vpop.permute.xlu1 %1212 }
 0x305   : > { %v1255_v32 = vmul.f32 %v1841_v25, %v1213_v54 }
 0x30c   : > { %v1220_v56 = vpop.permute.xlu1 %1219 }
 0x30d   : > { %v1256_v63 = vmul.f32 %v1841_v25, %v1220_v56 }
 0x358   : > { %v978_v58 = vpop.xlane.xlu2 %977 }
 0x359   : > { %v979_v60 = vmul.f32 0.03125, %v978_v58  ;;  %v2401_v58 = vpop.permute.xlu1 %1240 }
 0x35b   : > { %v980_v62 = vadd.f32 1e-05, %v979_v60 }
 0x35d   : > { %1859 = vrsqrt.f32 %v980_v62  ;;  %vm987_vm10 = vweird.f32 %v980_v62 }
 0x360   : > { %v2403_v59 = vpop.permute.xlu2 %1233 }
 0x363   : > { %v1860_v11 = vpop.eup %1859 }
 0x364   : > { %v982_v20 = vmul.f32 %v1860_v11, %v980_v62  ;;  %vm988_vm8 = vweird.f32 %v1860_v11 }
 0x365   : > { %vm989_vm11 = vmor %vm987_vm10, %vm988_vm8  ;;  %vm1375_vm8 = vcmask 31744  }
 0x366   : > { %v983_v22 = vmul.f32 %v1860_v11, %v982_v20  ;;  %v1842_v20 = vld [vmem:[%s2572_s13] ss:$0 sm:$0xff] }
 0x368   : > { %v984_v26 = vmul.f32 0.5, %v983_v22 }
 0x36a   : > { %v985_v29 = vsub.f32 1.5, %v984_v26 }
 0x36c   : > { %v986_v36 = vmul.f32 %v1860_v11, %v985_v29 }
 0x36e   : > { %v990_v38 = vsel %vm989_vm11, %v1860_v11, %v986_v36 }
 0x36f   : > { %v991_v39 = vmul.f32 %v990_v38, %v2335_v31 }
 0x371   : > { %v995_v43 = vmul.f32 %v1837_v37, %v991_v39 }
 0x373   : > { %v999_v45 = vadd.f32 %v1838_v21, %v995_v43  ;;  %v1257_v43 = vmul.f32 %v1841_v25, %v2399_v57 }
 0x375   : > { %v1108_v49 = vmul.f32 %v2381_v46, %v999_v45  ;;  %v1105_v31 = vmul.f32 %v2379_v44, %v999_v45  ;;  %v1111_v50 = vmul.f32 %v2383_v47, %v999_v45  ;;  %1000 = vst [vmem:[%s2391_s20] sm:$0xff] %v999_v45  ;;  %v1114_v53 = vmul.f32 %v2394_v52, %v999_v45  ;;  %s1915_s20 = scalar_lea.hbm %s2579_s21, 16 }
 0x376   : > { %p1917_p7 = scmp.lt.s32.totalorder %s1915_s20, %s1911_s2 }
 0x377   : > { %1109 = vadd.xlane.f32.xlu1 %v1108_v49  ;;  %1106 = vadd.xlane.f32.xlu0 %v1105_v31  ;;  %v1259_v49 = vmul.f32 %v1841_v25, %v2401_v58 }
 0x378   : > { %1112 = vadd.xlane.f32.xlu2 %v1111_v50  ;;  %p1918_p8 = por %p1917_p7, %p1916_p5 }
 0x37a   : > { %p1919_p10 = pnand %p1918_p8, %p1914_p4 }
 0x37f   : > { %1115 = vadd.xlane.f32.xlu0 %v1114_v53 }
 0x3ea   : > { %v1107_v60 = vpop.xlane.xlu0 %1106  ;;  %v1110_v61 = vpop.xlane.xlu1 %1109 }
 0x3eb   : > { %v1113_v62 = vpop.xlane.xlu2 %1112  ;;  %v1118_v0 = vsel %vm1117_vm12, %v1107_v60, %v1110_v61 }
 0x3ec   : > { %v1120_v4 = vsel %vm1119_vm13, %v1118_v0, %v1113_v62 }
 0x3f2   : > { %v1116_v1 = vpop.xlane.xlu0 %1115 }
 0x3f3   : > { %v1122_v5 = vsel %vm1121_vm14, %v1120_v4, %v1116_v1 }
 0x3f4   : > { %v1123_v6 = vmul.f32 0.17677669, %v1122_v5 }
 0x3f6   : > { %v1167_v7 = vperm.slane %v1123_v6, 6  ;;  %v1132_v9 = vperm.slane %v1123_v6, 1  ;;  %v1125_v11 = vperm.slane %v1123_v6, 0  ;;  %v1139_v10 = vperm.slane %v1123_v6, 2 }
 0x3f7   : > { %v1160_v14 = vperm.slane %v1123_v6, 5  ;;  %v1146_v17 = vperm.slane %v1123_v6, 3  ;;  %v1153_v18 = vperm.slane %v1123_v6, 4  ;;  %v1174_v19 = vperm.slane %v1123_v6, 7 }
 0x3f8   : > { %1172 = vperm.xlu0 %1827, %v1167_v7   ;;  %1137 = vperm.xlu2 %1829, %v1132_v9  }
 0x3f9   : > { %1130 = vperm.xlu1 %1828, %v1125_v11  }
 0x400   : > { %1247 = vperm.xlu0 %1827, %v1242_v12   ;;  %1144 = vperm.xlu2 %1829, %v1139_v10   ;;  %v1258_v12 = vmul.f32 %v1841_v25, %v2403_v59 }
 0x401   : > { %1165 = vperm.xlu1 %1828, %v1160_v14  }
 0x408   : > { %1151 = vperm.xlu2 %1829, %v1146_v17   ;;  %1832 = vset.pattern.permute.xlu0 %v2027_v3  ;;  %v2418_v3 = vld [vmem:[%s2574_s15] ss:$0 sm:$0xff] }
 0x409   : > { %1830 = vset.pattern.permute.xlu1 %v2026_v2 }
 0x410   : > { %1158 = vperm.xlu2 %1829, %v1153_v18  }
 0x418   : > { %1179 = vperm.xlu2 %1829, %v1174_v19  }
 0x420   : > { %1831 = vset.pattern.permute.xlu2 %v2026_v2 }
 0x452   : > { %v1138_v22 = vpop.permute.xlu2 %1137 }
 0x453   : > { %v1186_v24 = vmul.f32 %v1842_v20, %v1138_v22 }
 0x455   : > { %v1262_v26 = vadd.f32 %v1254_v23, %v1186_v24 }
 0x457   : > { %v1274_v27 = vadd.f32 %v2418_v3, %v1262_v26 }
 0x459   : > { %v1282_v29 = vmax.f32 %v1274_v27, 0.0 }
 0x45a   : > { %v1145_v30 = vpop.permute.xlu2 %1144 }
 0x45b   : > { %v1187_v15 = vmul.f32 %v1842_v20, %v1145_v30  ;;  %v1294_v33 = vmul.f32 %v2424_v28, %v1282_v29 }
 0x45d   : > { %v1263_v34 = vadd.f32 %v1255_v32, %v1187_v15  ;;  %v1305_v35 = vsel %vm1301_vm15, %v1294_v33, 0.0  ;;  %v1845_v33 = vld [vmem:[#allocation3] ss:$0 sm:$0xff] }
 0x45e   : > { %1306 = vadd.xlane.f32.xlu2 %v1305_v35 }
 0x45f   : > { %v1275_v36 = vadd.f32 %v2418_v3, %v1263_v34 }
 0x461   : > { %v1283_v37 = vmax.f32 %v1275_v36, 0.0 }
 0x462   : > { %v1152_v38 = vpop.permute.xlu2 %1151 }
 0x463   : > { %v1188_v8 = vmul.f32 %v1842_v20, %v1152_v38  ;;  %v1295_v21 = vmul.f32 %v2424_v28, %v1283_v37 }
 0x465   : > { %v1264_v39 = vadd.f32 %v1256_v63, %v1188_v8  ;;  %v1308_v40 = vsel %vm1301_vm15, %v1295_v21, 0.0 }
 0x466   : > { %1309 = vadd.xlane.f32.xlu0 %v1308_v40 }
 0x467   : > { %v1276_v41 = vadd.f32 %v2418_v3, %v1264_v39 }
 0x469   : > { %v1284_v42 = vmax.f32 %v1276_v41, 0.0 }
 0x46a   : > { %v1173_v45 = vpop.permute.xlu0 %1172  ;;  %v1159_v48 = vpop.permute.xlu2 %1158 }
 0x46b   : > { %v1191_v31 = vmul.f32 %v1842_v20, %v1173_v45  ;;  %v1189_v50 = vmul.f32 %v1842_v20, %v1159_v48  ;;  %v1131_v51 = vpop.permute.xlu1 %1130  ;;  %v1296_v53 = vmul.f32 %v2424_v28, %v1284_v42 }
 0x46c   : > { %v1185_v54 = vmul.f32 %v1842_v20, %v1131_v51 }
 0x46d   : > { %v1267_v56 = vadd.f32 %v1259_v49, %v1191_v31  ;;  %v1265_v60 = vadd.f32 %v1257_v43, %v1189_v50  ;;  %v1311_v61 = vsel %vm1301_vm15, %v1296_v53, 0.0 }
 0x46e   : > { %v1261_v62 = vadd.f32 %v1253_v13, %v1185_v54  ;;  %1312 = vadd.xlane.f32.xlu2 %v1311_v61  ;;  %v1341_v13 = vld [vmem:[%s799_s29] sm:$0xff]  ;;  %s1495_s29 = sshll.u32 %s2302_s22, 4  ;;  %s1496_s29 = int_to_ptr.vmem [resolvable:$true] %s1495_s29 }
 0x46f   : > { %v1277_v57 = vadd.f32 %v2418_v3, %v1265_v60  ;;  %v1279_v58 = vadd.f32 %v2418_v3, %v1267_v56  ;;  %vm1342_vm7 = vcmp.gt.s32.totalorder %v1341_v13, 0 }
 0x470   : > { %v1273_v0 = vadd.f32 %v2418_v3, %v1261_v62 }
 0x471   : > { %v1285_v1 = vmax.f32 %v1277_v57, 0.0  ;;  %v1287_v18 = vmax.f32 %v1279_v58, 0.0 }
 0x472   : > { %v1248_v4 = vpop.permute.xlu0 %1247  ;;  %v1180_v5 = vpop.permute.xlu2 %1179  ;;  %v1281_v6 = vmax.f32 %v1273_v0, 0.0 }
 0x473   : > { %v1260_v7 = vmul.f32 %v1841_v25, %v1248_v4  ;;  %v1192_v9 = vmul.f32 %v1842_v20, %v1180_v5  ;;  %v1166_v55 = vpop.permute.xlu1 %1165  ;;  %v1297_v11 = vmul.f32 %v2424_v28, %v1285_v1  ;;  %v1299_v26 = vmul.f32 %v2424_v28, %v1287_v18 }
 0x474   : > { %v1190_v10 = vmul.f32 %v1842_v20, %v1166_v55  ;;  %v1293_v14 = vmul.f32 %v2424_v28, %v1281_v6 }
 0x475   : > { %v1314_v17 = vsel %vm1301_vm15, %v1297_v11, 0.0  ;;  %v1268_v19 = vadd.f32 %v1260_v7, %v1192_v9  ;;  %v1320_v25 = vsel %vm1301_vm15, %v1299_v26, 0.0 }
 0x476   : > { %v1266_v22 = vadd.f32 %v1258_v12, %v1190_v10  ;;  %1315 = vadd.xlane.f32.xlu0 %v1314_v17  ;;  %v1302_v23 = vsel %vm1301_vm15, %v1293_v14, 0.0  ;;  %v2029_v10 = vmov 2  }
 0x477   : > { %1303 = vadd.xlane.f32.xlu1 %v1302_v23  ;;  %v1280_v27 = vadd.f32 %v2418_v3, %v1268_v19  ;;  %v2030_v19 = vmov 3  }
 0x478   : > { %v1278_v24 = vadd.f32 %v2418_v3, %v1266_v22 }
 0x479   : > { %v1288_v30 = vmax.f32 %v1280_v27, 0.0 }
 0x47a   : > { %v1286_v29 = vmax.f32 %v1278_v24, 0.0 }
 0x47b   : > { %v1300_v32 = vmul.f32 %v2424_v28, %v1288_v30 }
 0x47c   : > { %v1298_v59 = vmul.f32 %v2424_v28, %v1286_v29 }
 0x47d   : > { %v1323_v15 = vsel %vm1301_vm15, %v1300_v32, 0.0 }
 0x47e   : > { %1321 = vadd.xlane.f32.xlu0 %v1320_v25  ;;  %v1317_v20 = vsel %vm1301_vm15, %v1298_v59, 0.0 }
 0x47f   : > { %1318 = vadd.xlane.f32.xlu2 %v1317_v20 }
 0x487   : > { %1324 = vadd.xlane.f32.xlu2 %v1323_v15 }
 0x490   : > { %1330 = vperm.xlu1 %1830, %v1845_v33  }
 0x498   : > { %1833 = vset.pattern.permute.xlu1 %v2029_v10 }
 0x4d1   : > { %v1307_v34 = vpop.xlane.xlu2 %1306 }
 0x4d9   : > { %v1310_v35 = vpop.xlane.xlu0 %1309 }
 0x4e1   : > { %v1313_v3 = vpop.xlane.xlu2 %1312 }
 0x4e9   : > { %v1316_v37 = vpop.xlane.xlu0 %1315 }
 0x4ea   : > { %v1304_v36 = vpop.xlane.xlu1 %1303 }
 0x4f1   : > { %v1322_v28 = vpop.xlane.xlu0 %1321 }
 0x4f2   : > { %v1319_v38 = vpop.xlane.xlu2 %1318 }
 0x4fa   : > { %v1325_v49 = vpop.xlane.xlu2 %1324 }
 0x502   : > { %v1331_v63 = vpop.permute.xlu1 %1330 }
 0x503   : > { %v1333_v8 = vadd.f32 %v1331_v63, %v1304_v36  ;;  %v1334_v21 = vadd.f32 %v1331_v63, %v1307_v34  ;;  %v1335_v39 = vadd.f32 %v1331_v63, %v1310_v35  ;;  %v1336_v40 = vadd.f32 %v1331_v63, %v1313_v3 }
 0x504   : > { %v1337_v41 = vadd.f32 %v1331_v63, %v1316_v37  ;;  %v1338_v45 = vadd.f32 %v1331_v63, %v1319_v38  ;;  %v1339_v31 = vadd.f32 %v1331_v63, %v1322_v28  ;;  %v1340_v50 = vadd.f32 %v1331_v63, %v1325_v49 }
 0x505   : > { %v1351_v42 = vperm.slane %v1333_v8, %v2279_v16  ;;  %v1352_v43 = vperm.slane %v1334_v21, %v2279_v16  ;;  %v1353_v48 = vperm.slane %v1335_v39, %v2279_v16  ;;  %v1354_v51 = vperm.slane %v1336_v40, %v2279_v16 }
 0x506   : > { %v1355_v54 = vperm.slane %v1337_v41, %v2279_v16  ;;  %v1356_v60 = vperm.slane %v1338_v45, %v2279_v16  ;;  %v1357_v62 = vperm.slane %v1339_v31, %v2279_v16  ;;  %v1358_v0 = vperm.slane %v1340_v50, %v2279_v16 }
 0x507   : > { %v1360_v53 = vsel %vm1359_vm0, %v1352_v43, %v1351_v42 }
 0x508   : > { %v1362_v56 = vsel %vm1361_vm1, %v1353_v48, %v1360_v53 }
 0x509   : > { %v1364_v61 = vsel %vm1363_vm2, %v1354_v51, %v1362_v56 }
 0x50a   : > { %v1366_v57 = vsel %vm1365_vm3, %v1355_v54, %v1364_v61 }
 0x50b   : > { %v1368_v58 = vsel %vm1367_vm4, %v1356_v60, %v1366_v57 }
 0x50c   : > { %v1370_v1 = vsel %vm1369_vm5, %v1357_v62, %v1368_v58 }
 0x50d   : > { %v1372_v4 = vsel %vm1371_vm6, %v1358_v0, %v1370_v1 }
 0x50e   : > { %v1374_v5 = vsel %vm1342_vm7, %v1372_v4, -10000.0 }
 0x50f   : > { %vm1377_vm9 = vcmp.lt.f32.partialorder %v1374_v5, 0.0  ;;  %1376 = vst.msk [vmem:[%s807_s28] sm:$0xff] %vm1375_vm8, %v1374_v5  ;;  %s2487_s28 = scalar_lea.sflag [#allocation9], %s1446_s4 }
 0x510   : > { %v1378_v6 = vsel %vm1377_vm9, -10000.0, %v1374_v5  ;;  %v1414_v22 = vsel %vm1377_vm9, 1, %v2026_v2 }
 0x511   : > { %v1379_v7 = vsel %vm1375_vm8, %v1378_v6, -inf  ;;  %v1415_v23 = vsel %vm1375_vm8, %v1414_v22, 0 }
 0x512   : > { %1380 = vmax.xlane.f32.xlu0 %v1379_v7  ;;  %v1417_v24 = vshrl.u32 %v1415_v23, 16  ;;  %v1416_v26 = vand.u32 65535, %v1415_v23 }
 0x514   : > { %v1419_v27 = vcvt.s32.f32 %v1417_v24  ;;  %v1418_v2 = vcvt.s32.f32 %v1416_v26 }
 0x585   : > { %v1381_v9 = vpop.xlane.xlu0 %1380 }
 0x586   : > { %v1382_v55 = vsub.f32 %v1378_v6, %v1381_v9 }
 0x588   : > { %v1383_v16 = vmul.f32 1.442695, %v1382_v55 }
 0x58a   : > { %1861 = vpow2.f32 %v1383_v16 }
 0x590   : > { %v1862_v11 = vpop.eup %1861 }
 0x591   : > { %v1385_v12 = vsel %vm1375_vm8, %v1862_v11, 0.0 }
 0x592   : > { %1386 = vadd.xlane.f32.xlu1 %v1385_v12 }
 0x605   : > { %v1387_v14 = vpop.xlane.xlu1 %1386 }
 0x606   : > { %1863 = vrcp.f32 %v1387_v14 }
 0x60c   : > { %v1864_v17 = vpop.eup %1863 }
 0x60d   : > { %v1389_v18 = vmul.f32 %v1864_v17, %v1862_v11 }
 0x60f   : > { %1403 = vperm.xlu1 %1833, %v1389_v18   ;;  %1397 = vperm.xlu0 %1832, %v1389_v18  }
 0x610   : > { %1392 = vperm.xlu2 %1831, %v1389_v18  }
 0x617   : > { %1834 = vset.pattern.permute.xlu1 %v2030_v19  ;;  %1835 = vset.pattern.permute.xlu0 %v2030_v19 }
 0x618   : > { %1409 = vperm.xlu1 %1834, %v1389_v18  }
 0x619   : > { %1922 = shalt.err (!%p1919_p10)
}
 0x61a   : > { %1761 = dma.vmem_to_hbm [thread:$0]  (%p2206_p11), %s1482_s3, 128, %s1484_s26, %s2487_s28  }
 0x61b   : > { %s2630_s24 = sld [smem:[#allocation29_spill]] }
 0x621   : > { %s1494_s6 = scalar_lea.hbm %s2630_s24, %s1757_s30  ;;  %s1943_s3 = scalar_lea.hbm %s2630_s24, 32 }
 0x622   : > { %s1497_s7 = sshll.u32 %s1494_s6, 4  ;;  %s1498_s7 = int_to_ptr.hbm [resolvable:$true] %s1497_s7 }
 0x623   : > { %s1937_s17 = sshra.s32 %s1498_s7, 4  ;;  %s1938_s17 = int_to_ptr.hbm [resolvable:$true] %s1937_s17 }
 0x624   : > { %s1939_s2 = scalar_lea.hbm %s1938_s17, 16  ;;  %p1944_p0 = scmp.lt.s32.totalorder %s1938_s17, %s2630_s24 }
 0x625   : > { %p1940_p1 = scmp.ne.s32.totalorder %s1938_s17, %s1939_s2  ;;  %p1945_p6 = scmp.lt.s32.totalorder %s1943_s3, %s1939_s2 }
 0x627   : > { %p1941_p2 = pnand %p1940_p1, %p2206_p11  ;;  %p1946_p3 = por %p1945_p6, %p1944_p0 }
 0x629   : > { %p1942_p13 = pneg %p1941_p2 }
 0x62b   : > { %p1947_p4 = pnand %p1946_p3, %p1942_p13 }
 0x639   : > { %1422 = vadd.xlane.f32.xlu2 %v1419_v27  ;;  %1420 = vadd.xlane.f32.xlu0 %v1418_v2 }
 0x63a   : > { %1950 = shalt.err (!%p1947_p4)
}
 0x63b   : > { %s2031_s30 = smov 128   ;;  %s2032_s18 = smov 8  }
 0x63c   : > { %1762 = dma.vmem_to_hbm [thread:$0]  (%p2206_p11), %s1496_s29, 256, %s1498_s7, %s2487_s28, %s2031_s30, %s2031_s30, %s2032_s18  }
 0x63d   : > { %s2631_s4 = sshll.u32 %s2175_s8, 3  ;;  %s2632_s2 = sld [smem:[#allocation28_spill]] }
 0x63e   : > { %s2633_s28 = sld [smem:[#allocation27_spill]]  ;;  %s2634_s20 = sshll.u32 %s2240_s5, 3 }
 0x63f   : > { %s771_s3 = scalar_lea.vmem [#allocation7], %s2634_s20  ;;  %s1442_s22 = scalar_lea.sflag [#allocation6], %s2240_s5 }
 0x640   : > { %s1467_s26 = sshll.u32 %s771_s3, 4  ;;  %s1468_s26 = int_to_ptr.vmem [resolvable:$true] %s1467_s26 }
 0x643   : > { %s1465_s23 = scalar_lea.hbm %s2632_s2, %s2631_s4  ;;  %s1971_s17 = scalar_lea.hbm %s2632_s2, 16 }
 0x644   : > { %s1469_s8 = sshll.u32 %s1465_s23, 4  ;;  %s1470_s8 = int_to_ptr.hbm [resolvable:$true] %s1469_s8 }
 0x645   : > { %s1965_s30 = sshra.s32 %s1470_s8, 4  ;;  %s1966_s30 = int_to_ptr.hbm [resolvable:$true] %s1965_s30 }
 0x646   : > { %s1967_s18 = scalar_lea.hbm %s1966_s30, 8  ;;  %p1972_p10 = scmp.lt.s32.totalorder %s1966_s30, %s2632_s2 }
 0x647   : > { %p1968_p5 = scmp.ne.s32.totalorder %s1966_s30, %s1967_s18  ;;  %p1973_p1 = scmp.lt.s32.totalorder %s1971_s17, %s1967_s18 }
 0x649   : > { %p1969_p7 = pnand %p1968_p5, %p2206_p11  ;;  %p1974_p2 = por %p1973_p1, %p1972_p10 }
 0x64b   : > { %p1970_p8 = pneg %p1969_p7 }
 0x64d   : > { %p1975_p13 = pnand %p1974_p2, %p1970_p8 }
 0x66a   : > { %v1393_v59 = vpop.permute.xlu2 %1392 }
 0x66b   : > { %v1395_v30 = vmul.f32 %v1393_v59, %v2379_v44  ;;  %v1846_v44 = vld [vmem:[%s2633_s28] ss:$0 sm:$0xff] }
 0x681   : > { %v1404_v29 = vpop.permute.xlu1 %1403  ;;  %v1398_v25 = vpop.permute.xlu0 %1397 }
 0x682   : > { %v1400_v20 = vmul.f32 %v1398_v25, %v2381_v46  ;;  %v1406_v36 = vmul.f32 %v1404_v29, %v2383_v47 }
 0x684   : > { %v1401_v15 = vadd.f32 %v1400_v20, %v1395_v30 }
 0x686   : > { %v1407_v46 = vadd.f32 %v1406_v36, %v1401_v15 }
 0x68a   : > { %v1410_v32 = vpop.permute.xlu1 %1409 }
 0x68b   : > { %v1412_v37 = vmul.f32 %v1410_v32, %v2394_v52 }
 0x68d   : > { %v1413_v8 = vadd.f32 %v1412_v37, %v1407_v46 }
 0x6ac   : > { %v1423_v33 = vpop.xlane.xlu2 %1422  ;;  %v1421_v34 = vpop.xlane.xlu0 %1420 }
 0x6ad   : > { %v1425_v35 = vcvt.f32.s32 %v1423_v33  ;;  %v1424_v3 = vcvt.f32.s32 %v1421_v34 }
 0x6af   : > { %v1426_v38 = vshll.u32 %v1425_v35, 16 }
 0x6b1   : > { %v1427_v63 = vadd.s32 %v1426_v38, %v1424_v3 }
 0x6b3   : > { %vm1428_vm10 = vcmp.eq.s32.totalorder %v1427_v63, 4 }
 0x6b4   : > { %v1435_v21 = vsel %vm1428_vm10, %v1846_v44, %v1413_v8 }
 0x6b5   : > { %1436 = vst [vmem:[%s771_s3] sm:$0xff] %v1435_v21 }
 0x6b6   : > { %1978 = shalt.err (!%p1975_p13)
}
 0x6b7   : > { %1760 = dma.vmem_to_hbm [thread:$0]  (%p2206_p11), %s1468_s26, 128, %s1470_s8, %s1442_s22  }
 0x6b8 PF: > { %s2635_s5 = sld [smem:[#allocation14_spill]]  ;;  %p1771_p0 = pnand %p1708_p9, %p2210_p12 }
 0x6ba   : > { %p1772_p6 = pneg %p1771_p0 }
 0x6be   : > { %s1519_s28 = sand.u32 1, %s2635_s5  }
 0x6bf   : > { %s1520_s20 = scalar_lea.sflag [#allocation6], %s1519_s28 }
 0x6c0   : > { %2000 = dma.done.wait (%p1772_p6), %s1520_s20, 128  }
 0x6c1   : > { %2002 = vsyncadd (%p1772_p6), %s1520_s20, 4294967168  ;;  %s2637_s3 = sadd.s32 4294967294, %s2021_s1  }
 0x6c2   : > { %s1529_s30 = sand.u32 1, %s2637_s3  }
 0x6c3   : > { %s1530_s18 = scalar_lea.sflag [#allocation9], %s1529_s30 }
 0x6c4   : > { %2004 = dma.done.wait (%p1772_p6), %s1530_s18, 384  }
 0x6c5   : > { %2006 = vsyncadd (%p1772_p6), %s1530_s18, 4294966912  ;;  %s2638_s1 = sld [smem:[#allocation16_spill]]  ;;  %s2641_s4 = smov %s2013_s0 }
 0x6c6   : > { %s2639_s27 = sld [smem:[#allocation15_spill]] }
 0x6c7   : > { %s2640_s23 = sld [smem:[#allocation17_spill]] }
 0x6cb   : > { %p43_p11 = scmp.ge.s32.totalorder %s2638_s1, 4  }
 0x6cc   : > { %s2642_s0 = smov %s2639_s27 }
 0x6cd   :  { %45 = sbr.rel (!%p43_p11) target bundleno = 19 (0x13), region = 197 }
 0x6d2   :  { %1546 = vsyncpa [#allocation5], 1 }
 0x6d3   :  { %1548 = vsyncpa [#allocation5 + $0x1], 1 }
 0x6d4   :  { %1549 = vsyncpa [#allocation6], 1 }
 0x6d5   :  { %1551 = vsyncpa [#allocation6 + $0x1], 1 }
 0x6d6   :  { %1552 = vsyncpa [#allocation9], 1 }
 0x6d7   :  { %1554 = vsyncpa [#allocation9 + $0x1], 1 }

</bundles_post_ra>
